<compile_context>
chip_gen: v7x
topology: tpu7x:2x2x1
jax: 0.10.0
libtpu: 0.0.40
codegen_flags: <defaults>
</compile_context>

<pallas_src>
import functools

import jax
import jax.numpy as jnp
import numpy as np
from jax.experimental import pallas as pl
from jax.experimental.pallas import tpu as pltpu


def _stacked_lstm_kernel(x_ref,     # (TC, BB, C)  f32 time-major input chunk
                         w1_ref,    # (C, 4*H1)    bf16  Wih1^T, gates (i,f,o,g)
                         b1_ref,    # (1, 4*H1)    f32   bih1+bhh1
                         whh1_ref,  # (H1, 4*H1)   bf16  Whh1^T
                         wih2_ref,  # (H1, 4*H2)   bf16  Wih2^T
                         whh2_ref,  # (H2, 4*H2)   bf16  Whh2^T
                         b2_ref,    # (1, 4*H2)    f32   bih2+bhh2
                         out_ref,   # (BB, TC*H2)  f32   lane-dense chunk output
                         h1_ref, c1_ref, h2_ref, c2_ref):  # VMEM state carries
    TC, BB, C = x_ref.shape
    H1 = whh1_ref.shape[0]
    H2 = whh2_ref.shape[0]

    # Fresh recurrent state at the first time chunk of each batch block.
    @pl.when(pl.program_id(1) == 0)
    def _init():
        h1_ref[...] = jnp.zeros_like(h1_ref)
        c1_ref[...] = jnp.zeros_like(c1_ref)
        h2_ref[...] = jnp.zeros_like(h2_ref)
        c2_ref[...] = jnp.zeros_like(c2_ref)

    # ---- layer-1 input projection for the whole chunk (no HBM xp tensor) ----
    x_flat = x_ref[...].reshape(TC * BB, C).astype(jnp.bfloat16)
    xp = jnp.dot(x_flat, w1_ref[...], preferred_element_type=jnp.float32)
    xp = (xp + b1_ref[...]).reshape(TC, BB, 4 * H1)            # f32 gates (pre-recurrent)

    # Hoist weight loads / bias broadcast out of the recurrence.
    whh1 = whh1_ref[...]
    wih2 = wih2_ref[...]
    whh2 = whh2_ref[...]
    b2 = jnp.broadcast_to(b2_ref[...], (BB, 4 * H2))

    h1, c1 = h1_ref[...], c1_ref[...]
    h2, c2 = h2_ref[...], c2_ref[...]

    outs = []
    for j in range(TC):                       # modest static unroll: TC steps per chunk
        # ---- layer 1: recurrent matmul only (input term precomputed above) ----
        g1 = xp[j] + jnp.dot(h1.astype(jnp.bfloat16), whh1,
                             preferred_element_type=jnp.float32)
        a1 = jax.nn.sigmoid(g1[:, :3 * H1])   # i | f | o  (one full-width sigmoid)
        t1 = jnp.tanh(g1[:, 3 * H1:])         # g          (one full-width tanh)
        c1 = a1[:, H1:2 * H1] * c1 + a1[:, :H1] * t1
        h1 = a1[:, 2 * H1:3 * H1] * jnp.tanh(c1)

        # ---- layer 2: two dots (no per-step lane concat on the critical path) ----
        g2 = (jnp.dot(h1.astype(jnp.bfloat16), wih2, preferred_element_type=jnp.float32)
              + jnp.dot(h2.astype(jnp.bfloat16), whh2, preferred_element_type=jnp.float32)
              + b2)
        a2 = jax.nn.sigmoid(g2[:, :3 * H2])
        t2 = jnp.tanh(g2[:, 3 * H2:])
        c2 = a2[:, H2:2 * H2] * c2 + a2[:, :H2] * t2
        h2 = a2[:, 2 * H2:3 * H2] * jnp.tanh(c2)
        outs.append(h2)

    # Persist carries for the next time chunk.
    h1_ref[...], c1_ref[...] = h1, c1
    h2_ref[...], c2_ref[...] = h2, c2

    # Lane-dense output: one (BB, TC*H2) unmasked store per chunk (128 lanes at H2=16),
    # instead of TC separate 16-lane masked stores.
    out_ref[...] = jnp.concatenate(outs, axis=-1).astype(out_ref.dtype)


def _pick_time_chunk(T, H2):
    """Largest TC dividing T with TC*H2 a multiple of 128 (lane-dense chunk stores);
    falls back to a single chunk (block last dim == full extent, always legal)."""
    tc = max(1, 128 // max(H2, 1))
    tc = min(tc, T)
    while tc > 1 and (T % tc or (tc * H2) % 128):
        tc -= 1
    if T % tc or (tc * H2) % 128:
        return T
    return tc


@functools.partial(jax.jit, static_argnames=("H1", "H2"))
def lstm_encoder_forward(x, kernel_params, *, H1, H2):
    """x: (B, C, T) float32 (NCT, like the PyTorch module). Returns (x_enc, out)."""
    B, C, T = x.shape
    w1, b1, whh1, wih2, whh2, b2 = kernel_params

    BB = 8                                   # batch block = one sublane tile
    Bp = -(-B // BB) * BB                    # pad batch to fill sublanes / MXU rows
    TC = _pick_time_chunk(T, H2)

    # Time-major (T, Bp, C). This small transpose of x (C channels) is kept in the
    # wrapper; the expensive xp materialization and the output transpose are gone.
    x_seq = jnp.transpose(x, (2, 0, 1)).astype(jnp.float32)
    if Bp != B:
        x_seq = jnp.pad(x_seq, ((0, 0), (0, Bp - B), (0, 0)))

    out_flat = pl.pallas_call(
        _stacked_lstm_kernel,
        out_shape=jax.ShapeDtypeStruct((Bp, T * H2), jnp.float32),
        grid_spec=pltpu.PrefetchScalarGridSpec(
            num_scalar_prefetch=0,
            # (batch blocks: independent/"parallel" -> megacore on v7x,
            #  time chunks: sequential recurrence -> "arbitrary", innermost)
            grid=(Bp // BB, T // TC),
            in_specs=[
                pl.BlockSpec((TC, BB, C), lambda b, t: (t, b, 0)),
                pl.BlockSpec((C, 4 * H1), lambda b, t: (0, 0)),
                pl.BlockSpec((1, 4 * H1), lambda b, t: (0, 0)),
                pl.BlockSpec((H1, 4 * H1), lambda b, t: (0, 0)),
                pl.BlockSpec((H1, 4 * H2), lambda b, t: (0, 0)),
                pl.BlockSpec((H2, 4 * H2), lambda b, t: (0, 0)),
                pl.BlockSpec((1, 4 * H2), lambda b, t: (0, 0)),
            ],
            out_specs=pl.BlockSpec((BB, TC * H2), lambda b, t: (b, t)),
            scratch_shapes=[
                pltpu.VMEM((BB, H1), jnp.float32),   # h1 carry
                pltpu.VMEM((BB, H1), jnp.float32),   # c1 carry
                pltpu.VMEM((BB, H2), jnp.float32),   # h2 carry
                pltpu.VMEM((BB, H2), jnp.float32),   # c2 carry
            ],
        ),
        compiler_params=pltpu.CompilerParams(
            dimension_semantics=("parallel", "arbitrary"),
            # VMEM at these shapes is a few tens of KiB. When scaling T/B/H:
            # per-step footprint ~ 2*(TC*BB*C*4) in + 2*(BB*TC*H2*4) out double
            # buffers + weights; re-budget against 32 MiB scoped (64 MiB phys on
            # v7x) and set vmem_limit_bytes / shrink TC if needed.
        ),
    )(x_seq, w1, b1, whh1, wih2, whh2, b2)

    # (Bp, T*H2) -> (B, T, H2): slice off batch padding + free contiguous reshape
    # (no output transpose; output is already batch-first).
    out = out_flat[:B].reshape(B, T, H2)
    # last_h_state == layer-2 hidden at the final time step == out[:, -1, :]
    x_enc = jnp.broadcast_to(out[:, -1:, :], (B, T, H2))
    return x_enc, out


# ----------------------------- parameters ------------------------------------
def init_params(key, C, H1, H2):
    """PyTorch nn.LSTM-style params: W_ih (4H, in), W_hh (4H, H), b_ih, b_hh (4H,);
    gate row order (i, f, g, o); uniform(-1/sqrt(H), 1/sqrt(H))."""
    ks = jax.random.split(key, 8)

    def u(k, shape, bound):
        return jax.random.uniform(k, shape, jnp.float32, -bound, bound)

    s1 = 1.0 / np.sqrt(H1)
    s2 = 1.0 / np.sqrt(H2)
    return dict(
        wih1=u(ks[0], (4 * H1, C), s1), whh1=u(ks[1], (4 * H1, H1), s1),
        bih1=u(ks[2], (4 * H1,), s1), bhh1=u(ks[3], (4 * H1,), s1),
        wih2=u(ks[4], (4 * H2, H1), s2), whh2=u(ks[5], (4 * H2, H2), s2),
        bih2=u(ks[6], (4 * H2,), s2), bhh2=u(ks[7], (4 * H2,), s2),
    )


def _reorder_gates(w, H):
    """Reorder leading 4H gate axis from PyTorch (i,f,g,o) to kernel (i,f,o,g)."""
    i, f, g, o = w[:H], w[H:2 * H], w[2 * H:3 * H], w[3 * H:]
    return jnp.concatenate([i, f, o, g], axis=0)


def pack_params(p, H1, H2):
    """Kernel layout: transposed weights, gates reordered (i,f,o,g), biases
    pre-summed (kept f32), matmul weights cast to bf16 (f32 accumulation on MXU)."""
    wih1 = _reorder_gates(p["wih1"], H1)
    whh1 = _reorder_gates(p["whh1"], H1)
    b1 = _reorder_gates(p["bih1"] + p["bhh1"], H1)
    wih2 = _reorder_gates(p["wih2"], H2)
    whh2 = _reorder_gates(p["whh2"], H2)
    b2 = _reorder_gates(p["bih2"] + p["bhh2"], H2)
    return (wih1.T.astype(jnp.bfloat16),        # (C, 4*H1)
            b1[None, :].astype(jnp.float32),    # (1, 4*H1)
            whh1.T.astype(jnp.bfloat16),        # (H1, 4*H1)
            wih2.T.astype(jnp.bfloat16),        # (H1, 4*H2)
            whh2.T.astype(jnp.bfloat16),        # (H2, 4*H2)
            b2[None, :].astype(jnp.float32))    # (1, 4*H2)


# ----------------------- pure-JAX reference (lax.scan) -----------------------
def _lstm_ref(x_seq, wih, whh, bih, bhh, H):
    B = x_seq.shape[1]
    wih_t, whh_t = wih.T, whh.T
    b = (bih + bhh)[None, :]

    def step(carry, x_t):
        h, c = carry
        g = x_t @ wih_t + h @ whh_t + b
        i = jax.nn.sigmoid(g[:, :H])
        f = jax.nn.sigmoid(g[:, H:2 * H])
        gg = jnp.tanh(g[:, 2 * H:3 * H])
        o = jax.nn.sigmoid(g[:, 3 * H:])
        c = f * c + i * gg
        h = o * jnp.tanh(c)
        return (h, c), h

    init = (jnp.zeros((B, H), jnp.float32), jnp.zeros((B, H), jnp.float32))
    (h, _), ys = jax.lax.scan(step, init, x_seq)
    return ys, h


def _reference_forward(x, p, H1, H2):
    x_seq = jnp.transpose(x, (2, 0, 1))
    y1, _ = _lstm_ref(x_seq, p["wih1"], p["whh1"], p["bih1"], p["bhh1"], H1)
    y2, h2 = _lstm_ref(y1, p["wih2"], p["whh2"], p["bih2"], p["bhh2"], H2)
    out = jnp.transpose(y2, (1, 0, 2))
    B, _, T = x.shape
    x_enc = jnp.broadcast_to(h2[:, None, :], (B, T, H2))
    return x_enc, out


if __name__ == "__main__":
    # channels=4, timeStamps=8, embeddingSize=32 (-> H2=16), layers=1, batch=2
    B, C, T = 2, 4, 8
    H1, H2 = 32, 16

    key = jax.random.PRNGKey(0)
    kx, kp = jax.random.split(key)
    x = jax.random.normal(kx, (B, C, T), jnp.float32)   # NCT layout, like PyTorch
    params = init_params(kp, C, H1, H2)
    kernel_params = pack_params(params, H1, H2)

    x_enc, out = lstm_encoder_forward(x, kernel_params, H1=H1, H2=H2)
    jax.block_until_ready((x_enc, out))

    x_enc_exp, out_exp = _reference_forward(x, params, H1, H2)
    assert x_enc.shape == (B, T, H2) and out.shape == (B, T, H2)
    # Kernel uses bf16 MXU inputs with f32 accumulation; compare against the pure
    # f32 reference with a correspondingly loosened tolerance (observed error is
    # O(1e-3); real gate/ordering bugs would be O(1e-1)).
    np.testing.assert_allclose(np.asarray(out), np.asarray(out_exp), atol=3e-2, rtol=3e-2)
    np.testing.assert_allclose(np.asarray(x_enc), np.asarray(x_enc_exp), atol=3e-2, rtol=3e-2)

    print("KERNEL_OK")
</pallas_src>

<mosaic_0001>
module attributes {stable_mosaic.version = 11 : i64} {
  func.func @_stacked_lstm_kernel(%arg0: i32, %arg1: i32, %arg2: memref<8x8x4xf32, #tpu.memory_space<vmem>>, %arg3: memref<4x128xbf16, #tpu.memory_space<vmem>>, %arg4: memref<1x128xf32, #tpu.memory_space<vmem>>, %arg5: memref<32x128xbf16, #tpu.memory_space<vmem>>, %arg6: memref<32x64xbf16, #tpu.memory_space<vmem>>, %arg7: memref<16x64xbf16, #tpu.memory_space<vmem>>, %arg8: memref<1x64xf32, #tpu.memory_space<vmem>>, %arg9: memref<8x128xf32, #tpu.memory_space<vmem>>, %arg10: memref<8x32xf32, #tpu.memory_space<vmem>>, %arg11: memref<8x32xf32, #tpu.memory_space<vmem>>, %arg12: memref<8x16xf32, #tpu.memory_space<vmem>>, %arg13: memref<8x16xf32, #tpu.memory_space<vmem>>) attributes {dimension_semantics = [#tpu.dimension_semantics<parallel>, #tpu.dimension_semantics<arbitrary>], iteration_bounds = array<i64: 1, 1>, scalar_prefetch = 0 : i64, scratch_operands = 4 : i64, tpu.core_type = #tpu.core_type<tc>, window_params = [{transform_indices = @transform_0, window_bounds = array<i64: 8, 8, 4>}, {pipeline_mode = #tpu.pipeline_mode<synchronous>, transform_indices = @transform_1, window_bounds = array<i64: 4, 128>}, {pipeline_mode = #tpu.pipeline_mode<synchronous>, transform_indices = @transform_2, window_bounds = array<i64: 1, 128>}, {pipeline_mode = #tpu.pipeline_mode<synchronous>, transform_indices = @transform_3, window_bounds = array<i64: 32, 128>}, {pipeline_mode = #tpu.pipeline_mode<synchronous>, transform_indices = @transform_4, window_bounds = array<i64: 32, 64>}, {pipeline_mode = #tpu.pipeline_mode<synchronous>, transform_indices = @transform_5, window_bounds = array<i64: 16, 64>}, {pipeline_mode = #tpu.pipeline_mode<synchronous>, transform_indices = @transform_6, window_bounds = array<i64: 1, 64>}, {transform_indices = @transform_7, window_bounds = array<i64: 8, 128>}]} {
    %c0_i32 = arith.constant 0 : i32
    %0 = arith.cmpi eq, %arg1, %c0_i32 : i32
    %1 = arith.extui %0 : i1 to i32
    %c0_i32_0 = arith.constant 0 : i32
    %2 = arith.cmpi ne, %1, %c0_i32_0 : i32
    scf.if %2 {
      %cst_73 = arith.constant 0.000000e+00 : f32
      %372 = vector.broadcast %cst_73 : f32 to vector<8x32xf32>
      %c0_74 = arith.constant 0 : index
      %c0_75 = arith.constant 0 : index
      %373 = vector.load %arg10[%c0_74, %c0_75] : memref<8x32xf32, #tpu.memory_space<vmem>>, vector<8x32xf32>
      tpu.vector_store %arg10[%c0_74, %c0_75], %372 {strides = array<i32>} : memref<8x32xf32, #tpu.memory_space<vmem>>, vector<8x32xf32>,
      %cst_76 = arith.constant 0.000000e+00 : f32
      %374 = vector.broadcast %cst_76 : f32 to vector<8x32xf32>
      %c0_77 = arith.constant 0 : index
      %c0_78 = arith.constant 0 : index
      %375 = vector.load %arg11[%c0_77, %c0_78] : memref<8x32xf32, #tpu.memory_space<vmem>>, vector<8x32xf32>
      tpu.vector_store %arg11[%c0_77, %c0_78], %374 {strides = array<i32>} : memref<8x32xf32, #tpu.memory_space<vmem>>, vector<8x32xf32>,
      %cst_79 = arith.constant 0.000000e+00 : f32
      %376 = vector.broadcast %cst_79 : f32 to vector<8x16xf32>
      %c0_80 = arith.constant 0 : index
      %c0_81 = arith.constant 0 : index
      %377 = vector.load %arg12[%c0_80, %c0_81] : memref<8x16xf32, #tpu.memory_space<vmem>>, vector<8x16xf32>
      tpu.vector_store %arg12[%c0_80, %c0_81], %376 {strides = array<i32>} : memref<8x16xf32, #tpu.memory_space<vmem>>, vector<8x16xf32>,
      %cst_82 = arith.constant 0.000000e+00 : f32
      %378 = vector.broadcast %cst_82 : f32 to vector<8x16xf32>
      %c0_83 = arith.constant 0 : index
      %c0_84 = arith.constant 0 : index
      %379 = vector.load %arg13[%c0_83, %c0_84] : memref<8x16xf32, #tpu.memory_space<vmem>>, vector<8x16xf32>
      tpu.vector_store %arg13[%c0_83, %c0_84], %378 {strides = array<i32>} : memref<8x16xf32, #tpu.memory_space<vmem>>, vector<8x16xf32>,
    } else {
    }
    %c0 = arith.constant 0 : index
    %c0_1 = arith.constant 0 : index
    %c0_2 = arith.constant 0 : index
    %3 = vector.load %arg2[%c0, %c0_1, %c0_2] : memref<8x8x4xf32, #tpu.memory_space<vmem>>, vector<8x8x4xf32>
    %4 = vector.shape_cast %3 : vector<8x8x4xf32> to vector<64x4xf32>
    %5 = arith.truncf %4 : vector<64x4xf32> to vector<64x4xbf16>
    %c0_3 = arith.constant 0 : index
    %c0_4 = arith.constant 0 : index
    %6 = vector.load %arg3[%c0_3, %c0_4] : memref<4x128xbf16, #tpu.memory_space<vmem>>, vector<4x128xbf16>
    %cst = arith.constant dense<0.000000e+00> : vector<64x128xf32>
    %7 = tpu.matmul %5, %6, %cst {dimension_numbers = #tpu.dot_dimension_numbers<[1], [0], [0], [1], [0, 0, 1, 1], [], []>} : vector<64x4xbf16>, vector<4x128xbf16>, vector<64x128xf32> -> vector<64x128xf32>
    %c0_5 = arith.constant 0 : index
    %c0_6 = arith.constant 0 : index
    %8 = vector.load %arg4[%c0_5, %c0_6] : memref<1x128xf32, #tpu.memory_space<vmem>>, vector<1x128xf32>
    %9 = vector.broadcast %8 : vector<1x128xf32> to vector<64x128xf32>
    %10 = arith.addf %7, %9 : vector<64x128xf32>
    %11 = vector.shape_cast %10 : vector<64x128xf32> to vector<8x8x128xf32>
    %c0_7 = arith.constant 0 : index
    %c0_8 = arith.constant 0 : index
    %12 = vector.load %arg5[%c0_7, %c0_8] : memref<32x128xbf16, #tpu.memory_space<vmem>>, vector<32x128xbf16>
    %c0_9 = arith.constant 0 : index
    %c0_10 = arith.constant 0 : index
    %13 = vector.load %arg6[%c0_9, %c0_10] : memref<32x64xbf16, #tpu.memory_space<vmem>>, vector<32x64xbf16>
    %c0_11 = arith.constant 0 : index
    %c0_12 = arith.constant 0 : index
    %14 = vector.load %arg7[%c0_11, %c0_12] : memref<16x64xbf16, #tpu.memory_space<vmem>>, vector<16x64xbf16>
    %c0_13 = arith.constant 0 : index
    %c0_14 = arith.constant 0 : index
    %15 = vector.load %arg8[%c0_13, %c0_14] : memref<1x64xf32, #tpu.memory_space<vmem>>, vector<1x64xf32>
    %16 = vector.shape_cast %15 : vector<1x64xf32> to vector<1x64xf32>
    %17 = vector.broadcast %16 : vector<1x64xf32> to vector<8x64xf32>
    %c0_15 = arith.constant 0 : index
    %c0_16 = arith.constant 0 : index
    %18 = vector.load %arg10[%c0_15, %c0_16] : memref<8x32xf32, #tpu.memory_space<vmem>>, vector<8x32xf32>
    %c0_17 = arith.constant 0 : index
    %c0_18 = arith.constant 0 : index
    %19 = vector.load %arg11[%c0_17, %c0_18] : memref<8x32xf32, #tpu.memory_space<vmem>>, vector<8x32xf32>
    %c0_19 = arith.constant 0 : index
    %c0_20 = arith.constant 0 : index
    %20 = vector.load %arg12[%c0_19, %c0_20] : memref<8x16xf32, #tpu.memory_space<vmem>>, vector<8x16xf32>
    %c0_21 = arith.constant 0 : index
    %c0_22 = arith.constant 0 : index
    %21 = vector.load %arg13[%c0_21, %c0_22] : memref<8x16xf32, #tpu.memory_space<vmem>>, vector<8x16xf32>
    %22 = vector.extract_strided_slice %11 {offsets = [0, 0, 0], sizes = [1, 8, 128], strides = [1, 1, 1]} : vector<8x8x128xf32> to vector<1x8x128xf32>
    %23 = vector.shape_cast %22 : vector<1x8x128xf32> to vector<8x128xf32>
    %24 = arith.truncf %18 : vector<8x32xf32> to vector<8x32xbf16>
    %cst_23 = arith.constant dense<0.000000e+00> : vector<8x128xf32>
    %25 = tpu.matmul %24, %12, %cst_23 {dimension_numbers = #tpu.dot_dimension_numbers<[1], [0], [0], [1], [0, 0, 1, 1], [], []>} : vector<8x32xbf16>, vector<32x128xbf16>, vector<8x128xf32> -> vector<8x128xf32>
    %26 = arith.addf %23, %25 : vector<8x128xf32>
    %27 = vector.extract_strided_slice %26 {offsets = [0, 0], sizes = [8, 96], strides = [1, 1]} : vector<8x128xf32> to vector<8x96xf32>
    %28 = arith.negf %27 : vector<8x96xf32>
    %29 = math.exp %28 : vector<8x96xf32>
    %cst_24 = arith.constant 1.000000e+00 : f32
    %30 = vector.broadcast %cst_24 : f32 to vector<8x96xf32>
    %31 = arith.addf %30, %29 : vector<8x96xf32>
    %32 = arith.divf %30, %31 : vector<8x96xf32>
    %33 = vector.extract_strided_slice %26 {offsets = [0, 96], sizes = [8, 32], strides = [1, 1]} : vector<8x128xf32> to vector<8x32xf32>
    %34 = math.tanh %33 : vector<8x32xf32>
    %35 = vector.extract_strided_slice %32 {offsets = [0, 32], sizes = [8, 32], strides = [1, 1]} : vector<8x96xf32> to vector<8x32xf32>
    %36 = arith.mulf %35, %19 : vector<8x32xf32>
    %37 = vector.extract_strided_slice %32 {offsets = [0, 0], sizes = [8, 32], strides = [1, 1]} : vector<8x96xf32> to vector<8x32xf32>
    %38 = arith.mulf %37, %34 : vector<8x32xf32>
    %39 = arith.addf %36, %38 : vector<8x32xf32>
    %40 = vector.extract_strided_slice %32 {offsets = [0, 64], sizes = [8, 32], strides = [1, 1]} : vector<8x96xf32> to vector<8x32xf32>
    %41 = math.tanh %39 : vector<8x32xf32>
    %42 = arith.mulf %40, %41 : vector<8x32xf32>
    %43 = arith.truncf %42 : vector<8x32xf32> to vector<8x32xbf16>
    %cst_25 = arith.constant dense<0.000000e+00> : vector<8x64xf32>
    %44 = tpu.matmul %43, %13, %cst_25 {dimension_numbers = #tpu.dot_dimension_numbers<[1], [0], [0], [1], [0, 0, 1, 1], [], []>} : vector<8x32xbf16>, vector<32x64xbf16>, vector<8x64xf32> -> vector<8x64xf32>
    %45 = arith.truncf %20 : vector<8x16xf32> to vector<8x16xbf16>
    %cst_26 = arith.constant dense<0.000000e+00> : vector<8x64xf32>
    %46 = tpu.matmul %45, %14, %cst_26 {dimension_numbers = #tpu.dot_dimension_numbers<[1], [0], [0], [1], [0, 0, 1, 1], [], []>} : vector<8x16xbf16>, vector<16x64xbf16>, vector<8x64xf32> -> vector<8x64xf32>
    %47 = arith.addf %44, %46 : vector<8x64xf32>
    %48 = arith.addf %47, %17 : vector<8x64xf32>
    %49 = vector.extract_strided_slice %48 {offsets = [0, 0], sizes = [8, 48], strides = [1, 1]} : vector<8x64xf32> to vector<8x48xf32>
    %50 = arith.negf %49 : vector<8x48xf32>
    %51 = math.exp %50 : vector<8x48xf32>
    %cst_27 = arith.constant 1.000000e+00 : f32
    %52 = vector.broadcast %cst_27 : f32 to vector<8x48xf32>
    %53 = arith.addf %52, %51 : vector<8x48xf32>
    %54 = arith.divf %52, %53 : vector<8x48xf32>
    %55 = vector.extract_strided_slice %48 {offsets = [0, 48], sizes = [8, 16], strides = [1, 1]} : vector<8x64xf32> to vector<8x16xf32>
    %56 = math.tanh %55 : vector<8x16xf32>
    %57 = vector.extract_strided_slice %54 {offsets = [0, 16], sizes = [8, 16], strides = [1, 1]} : vector<8x48xf32> to vector<8x16xf32>
    %58 = arith.mulf %57, %21 : vector<8x16xf32>
    %59 = vector.extract_strided_slice %54 {offsets = [0, 0], sizes = [8, 16], strides = [1, 1]} : vector<8x48xf32> to vector<8x16xf32>
    %60 = arith.mulf %59, %56 : vector<8x16xf32>
    %61 = arith.addf %58, %60 : vector<8x16xf32>
    %62 = vector.extract_strided_slice %54 {offsets = [0, 32], sizes = [8, 16], strides = [1, 1]} : vector<8x48xf32> to vector<8x16xf32>
    %63 = math.tanh %61 : vector<8x16xf32>
    %64 = arith.mulf %62, %63 : vector<8x16xf32>
    %65 = vector.extract_strided_slice %11 {offsets = [1, 0, 0], sizes = [1, 8, 128], strides = [1, 1, 1]} : vector<8x8x128xf32> to vector<1x8x128xf32>
    %66 = vector.shape_cast %65 : vector<1x8x128xf32> to vector<8x128xf32>
    %67 = arith.truncf %42 : vector<8x32xf32> to vector<8x32xbf16>
    %cst_28 = arith.constant dense<0.000000e+00> : vector<8x128xf32>
    %68 = tpu.matmul %67, %12, %cst_28 {dimension_numbers = #tpu.dot_dimension_numbers<[1], [0], [0], [1], [0, 0, 1, 1], [], []>} : vector<8x32xbf16>, vector<32x128xbf16>, vector<8x128xf32> -> vector<8x128xf32>
    %69 = arith.addf %66, %68 : vector<8x128xf32>
    %70 = vector.extract_strided_slice %69 {offsets = [0, 0], sizes = [8, 96], strides = [1, 1]} : vector<8x128xf32> to vector<8x96xf32>
    %71 = arith.negf %70 : vector<8x96xf32>
    %72 = math.exp %71 : vector<8x96xf32>
    %cst_29 = arith.constant 1.000000e+00 : f32
    %73 = vector.broadcast %cst_29 : f32 to vector<8x96xf32>
    %74 = arith.addf %73, %72 : vector<8x96xf32>
    %75 = arith.divf %73, %74 : vector<8x96xf32>
    %76 = vector.extract_strided_slice %69 {offsets = [0, 96], sizes = [8, 32], strides = [1, 1]} : vector<8x128xf32> to vector<8x32xf32>
    %77 = math.tanh %76 : vector<8x32xf32>
    %78 = vector.extract_strided_slice %75 {offsets = [0, 32], sizes = [8, 32], strides = [1, 1]} : vector<8x96xf32> to vector<8x32xf32>
    %79 = arith.mulf %78, %39 : vector<8x32xf32>
    %80 = vector.extract_strided_slice %75 {offsets = [0, 0], sizes = [8, 32], strides = [1, 1]} : vector<8x96xf32> to vector<8x32xf32>
    %81 = arith.mulf %80, %77 : vector<8x32xf32>
    %82 = arith.addf %79, %81 : vector<8x32xf32>
    %83 = vector.extract_strided_slice %75 {offsets = [0, 64], sizes = [8, 32], strides = [1, 1]} : vector<8x96xf32> to vector<8x32xf32>
    %84 = math.tanh %82 : vector<8x32xf32>
    %85 = arith.mulf %83, %84 : vector<8x32xf32>
    %86 = arith.truncf %85 : vector<8x32xf32> to vector<8x32xbf16>
    %cst_30 = arith.constant dense<0.000000e+00> : vector<8x64xf32>
    %87 = tpu.matmul %86, %13, %cst_30 {dimension_numbers = #tpu.dot_dimension_numbers<[1], [0], [0], [1], [0, 0, 1, 1], [], []>} : vector<8x32xbf16>, vector<32x64xbf16>, vector<8x64xf32> -> vector<8x64xf32>
    %88 = arith.truncf %64 : vector<8x16xf32> to vector<8x16xbf16>
    %cst_31 = arith.constant dense<0.000000e+00> : vector<8x64xf32>
    %89 = tpu.matmul %88, %14, %cst_31 {dimension_numbers = #tpu.dot_dimension_numbers<[1], [0], [0], [1], [0, 0, 1, 1], [], []>} : vector<8x16xbf16>, vector<16x64xbf16>, vector<8x64xf32> -> vector<8x64xf32>
    %90 = arith.addf %87, %89 : vector<8x64xf32>
    %91 = arith.addf %90, %17 : vector<8x64xf32>
    %92 = vector.extract_strided_slice %91 {offsets = [0, 0], sizes = [8, 48], strides = [1, 1]} : vector<8x64xf32> to vector<8x48xf32>
    %93 = arith.negf %92 : vector<8x48xf32>
    %94 = math.exp %93 : vector<8x48xf32>
    %cst_32 = arith.constant 1.000000e+00 : f32
    %95 = vector.broadcast %cst_32 : f32 to vector<8x48xf32>
    %96 = arith.addf %95, %94 : vector<8x48xf32>
    %97 = arith.divf %95, %96 : vector<8x48xf32>
    %98 = vector.extract_strided_slice %91 {offsets = [0, 48], sizes = [8, 16], strides = [1, 1]} : vector<8x64xf32> to vector<8x16xf32>
    %99 = math.tanh %98 : vector<8x16xf32>
    %100 = vector.extract_strided_slice %97 {offsets = [0, 16], sizes = [8, 16], strides = [1, 1]} : vector<8x48xf32> to vector<8x16xf32>
    %101 = arith.mulf %100, %61 : vector<8x16xf32>
    %102 = vector.extract_strided_slice %97 {offsets = [0, 0], sizes = [8, 16], strides = [1, 1]} : vector<8x48xf32> to vector<8x16xf32>
    %103 = arith.mulf %102, %99 : vector<8x16xf32>
    %104 = arith.addf %101, %103 : vector<8x16xf32>
    %105 = vector.extract_strided_slice %97 {offsets = [0, 32], sizes = [8, 16], strides = [1, 1]} : vector<8x48xf32> to vector<8x16xf32>
    %106 = math.tanh %104 : vector<8x16xf32>
    %107 = arith.mulf %105, %106 : vector<8x16xf32>
    %108 = vector.extract_strided_slice %11 {offsets = [2, 0, 0], sizes = [1, 8, 128], strides = [1, 1, 1]} : vector<8x8x128xf32> to vector<1x8x128xf32>
    %109 = vector.shape_cast %108 : vector<1x8x128xf32> to vector<8x128xf32>
    %110 = arith.truncf %85 : vector<8x32xf32> to vector<8x32xbf16>
    %cst_33 = arith.constant dense<0.000000e+00> : vector<8x128xf32>
    %111 = tpu.matmul %110, %12, %cst_33 {dimension_numbers = #tpu.dot_dimension_numbers<[1], [0], [0], [1], [0, 0, 1, 1], [], []>} : vector<8x32xbf16>, vector<32x128xbf16>, vector<8x128xf32> -> vector<8x128xf32>
    %112 = arith.addf %109, %111 : vector<8x128xf32>
    %113 = vector.extract_strided_slice %112 {offsets = [0, 0], sizes = [8, 96], strides = [1, 1]} : vector<8x128xf32> to vector<8x96xf32>
    %114 = arith.negf %113 : vector<8x96xf32>
    %115 = math.exp %114 : vector<8x96xf32>
    %cst_34 = arith.constant 1.000000e+00 : f32
    %116 = vector.broadcast %cst_34 : f32 to vector<8x96xf32>
    %117 = arith.addf %116, %115 : vector<8x96xf32>
    %118 = arith.divf %116, %117 : vector<8x96xf32>
    %119 = vector.extract_strided_slice %112 {offsets = [0, 96], sizes = [8, 32], strides = [1, 1]} : vector<8x128xf32> to vector<8x32xf32>
    %120 = math.tanh %119 : vector<8x32xf32>
    %121 = vector.extract_strided_slice %118 {offsets = [0, 32], sizes = [8, 32], strides = [1, 1]} : vector<8x96xf32> to vector<8x32xf32>
    %122 = arith.mulf %121, %82 : vector<8x32xf32>
    %123 = vector.extract_strided_slice %118 {offsets = [0, 0], sizes = [8, 32], strides = [1, 1]} : vector<8x96xf32> to vector<8x32xf32>
    %124 = arith.mulf %123, %120 : vector<8x32xf32>
    %125 = arith.addf %122, %124 : vector<8x32xf32>
    %126 = vector.extract_strided_slice %118 {offsets = [0, 64], sizes = [8, 32], strides = [1, 1]} : vector<8x96xf32> to vector<8x32xf32>
    %127 = math.tanh %125 : vector<8x32xf32>
    %128 = arith.mulf %126, %127 : vector<8x32xf32>
    %129 = arith.truncf %128 : vector<8x32xf32> to vector<8x32xbf16>
    %cst_35 = arith.constant dense<0.000000e+00> : vector<8x64xf32>
    %130 = tpu.matmul %129, %13, %cst_35 {dimension_numbers = #tpu.dot_dimension_numbers<[1], [0], [0], [1], [0, 0, 1, 1], [], []>} : vector<8x32xbf16>, vector<32x64xbf16>, vector<8x64xf32> -> vector<8x64xf32>
    %131 = arith.truncf %107 : vector<8x16xf32> to vector<8x16xbf16>
    %cst_36 = arith.constant dense<0.000000e+00> : vector<8x64xf32>
    %132 = tpu.matmul %131, %14, %cst_36 {dimension_numbers = #tpu.dot_dimension_numbers<[1], [0], [0], [1], [0, 0, 1, 1], [], []>} : vector<8x16xbf16>, vector<16x64xbf16>, vector<8x64xf32> -> vector<8x64xf32>
    %133 = arith.addf %130, %132 : vector<8x64xf32>
    %134 = arith.addf %133, %17 : vector<8x64xf32>
    %135 = vector.extract_strided_slice %134 {offsets = [0, 0], sizes = [8, 48], strides = [1, 1]} : vector<8x64xf32> to vector<8x48xf32>
    %136 = arith.negf %135 : vector<8x48xf32>
    %137 = math.exp %136 : vector<8x48xf32>
    %cst_37 = arith.constant 1.000000e+00 : f32
    %138 = vector.broadcast %cst_37 : f32 to vector<8x48xf32>
    %139 = arith.addf %138, %137 : vector<8x48xf32>
    %140 = arith.divf %138, %139 : vector<8x48xf32>
    %141 = vector.extract_strided_slice %134 {offsets = [0, 48], sizes = [8, 16], strides = [1, 1]} : vector<8x64xf32> to vector<8x16xf32>
    %142 = math.tanh %141 : vector<8x16xf32>
    %143 = vector.extract_strided_slice %140 {offsets = [0, 16], sizes = [8, 16], strides = [1, 1]} : vector<8x48xf32> to vector<8x16xf32>
    %144 = arith.mulf %143, %104 : vector<8x16xf32>
    %145 = vector.extract_strided_slice %140 {offsets = [0, 0], sizes = [8, 16], strides = [1, 1]} : vector<8x48xf32> to vector<8x16xf32>
    %146 = arith.mulf %145, %142 : vector<8x16xf32>
    %147 = arith.addf %144, %146 : vector<8x16xf32>
    %148 = vector.extract_strided_slice %140 {offsets = [0, 32], sizes = [8, 16], strides = [1, 1]} : vector<8x48xf32> to vector<8x16xf32>
    %149 = math.tanh %147 : vector<8x16xf32>
    %150 = arith.mulf %148, %149 : vector<8x16xf32>
    %151 = vector.extract_strided_slice %11 {offsets = [3, 0, 0], sizes = [1, 8, 128], strides = [1, 1, 1]} : vector<8x8x128xf32> to vector<1x8x128xf32>
    %152 = vector.shape_cast %151 : vector<1x8x128xf32> to vector<8x128xf32>
    %153 = arith.truncf %128 : vector<8x32xf32> to vector<8x32xbf16>
    %cst_38 = arith.constant dense<0.000000e+00> : vector<8x128xf32>
    %154 = tpu.matmul %153, %12, %cst_38 {dimension_numbers = #tpu.dot_dimension_numbers<[1], [0], [0], [1], [0, 0, 1, 1], [], []>} : vector<8x32xbf16>, vector<32x128xbf16>, vector<8x128xf32> -> vector<8x128xf32>
    %155 = arith.addf %152, %154 : vector<8x128xf32>
    %156 = vector.extract_strided_slice %155 {offsets = [0, 0], sizes = [8, 96], strides = [1, 1]} : vector<8x128xf32> to vector<8x96xf32>
    %157 = arith.negf %156 : vector<8x96xf32>
    %158 = math.exp %157 : vector<8x96xf32>
    %cst_39 = arith.constant 1.000000e+00 : f32
    %159 = vector.broadcast %cst_39 : f32 to vector<8x96xf32>
    %160 = arith.addf %159, %158 : vector<8x96xf32>
    %161 = arith.divf %159, %160 : vector<8x96xf32>
    %162 = vector.extract_strided_slice %155 {offsets = [0, 96], sizes = [8, 32], strides = [1, 1]} : vector<8x128xf32> to vector<8x32xf32>
    %163 = math.tanh %162 : vector<8x32xf32>
    %164 = vector.extract_strided_slice %161 {offsets = [0, 32], sizes = [8, 32], strides = [1, 1]} : vector<8x96xf32> to vector<8x32xf32>
    %165 = arith.mulf %164, %125 : vector<8x32xf32>
    %166 = vector.extract_strided_slice %161 {offsets = [0, 0], sizes = [8, 32], strides = [1, 1]} : vector<8x96xf32> to vector<8x32xf32>
    %167 = arith.mulf %166, %163 : vector<8x32xf32>
    %168 = arith.addf %165, %167 : vector<8x32xf32>
    %169 = vector.extract_strided_slice %161 {offsets = [0, 64], sizes = [8, 32], strides = [1, 1]} : vector<8x96xf32> to vector<8x32xf32>
    %170 = math.tanh %168 : vector<8x32xf32>
    %171 = arith.mulf %169, %170 : vector<8x32xf32>
    %172 = arith.truncf %171 : vector<8x32xf32> to vector<8x32xbf16>
    %cst_40 = arith.constant dense<0.000000e+00> : vector<8x64xf32>
    %173 = tpu.matmul %172, %13, %cst_40 {dimension_numbers = #tpu.dot_dimension_numbers<[1], [0], [0], [1], [0, 0, 1, 1], [], []>} : vector<8x32xbf16>, vector<32x64xbf16>, vector<8x64xf32> -> vector<8x64xf32>
    %174 = arith.truncf %150 : vector<8x16xf32> to vector<8x16xbf16>
    %cst_41 = arith.constant dense<0.000000e+00> : vector<8x64xf32>
    %175 = tpu.matmul %174, %14, %cst_41 {dimension_numbers = #tpu.dot_dimension_numbers<[1], [0], [0], [1], [0, 0, 1, 1], [], []>} : vector<8x16xbf16>, vector<16x64xbf16>, vector<8x64xf32> -> vector<8x64xf32>
    %176 = arith.addf %173, %175 : vector<8x64xf32>
    %177 = arith.addf %176, %17 : vector<8x64xf32>
    %178 = vector.extract_strided_slice %177 {offsets = [0, 0], sizes = [8, 48], strides = [1, 1]} : vector<8x64xf32> to vector<8x48xf32>
    %179 = arith.negf %178 : vector<8x48xf32>
    %180 = math.exp %179 : vector<8x48xf32>
    %cst_42 = arith.constant 1.000000e+00 : f32
    %181 = vector.broadcast %cst_42 : f32 to vector<8x48xf32>
    %182 = arith.addf %181, %180 : vector<8x48xf32>
    %183 = arith.divf %181, %182 : vector<8x48xf32>
    %184 = vector.extract_strided_slice %177 {offsets = [0, 48], sizes = [8, 16], strides = [1, 1]} : vector<8x64xf32> to vector<8x16xf32>
    %185 = math.tanh %184 : vector<8x16xf32>
    %186 = vector.extract_strided_slice %183 {offsets = [0, 16], sizes = [8, 16], strides = [1, 1]} : vector<8x48xf32> to vector<8x16xf32>
    %187 = arith.mulf %186, %147 : vector<8x16xf32>
    %188 = vector.extract_strided_slice %183 {offsets = [0, 0], sizes = [8, 16], strides = [1, 1]} : vector<8x48xf32> to vector<8x16xf32>
    %189 = arith.mulf %188, %185 : vector<8x16xf32>
    %190 = arith.addf %187, %189 : vector<8x16xf32>
    %191 = vector.extract_strided_slice %183 {offsets = [0, 32], sizes = [8, 16], strides = [1, 1]} : vector<8x48xf32> to vector<8x16xf32>
    %192 = math.tanh %190 : vector<8x16xf32>
    %193 = arith.mulf %191, %192 : vector<8x16xf32>
    %194 = vector.extract_strided_slice %11 {offsets = [4, 0, 0], sizes = [1, 8, 128], strides = [1, 1, 1]} : vector<8x8x128xf32> to vector<1x8x128xf32>
    %195 = vector.shape_cast %194 : vector<1x8x128xf32> to vector<8x128xf32>
    %196 = arith.truncf %171 : vector<8x32xf32> to vector<8x32xbf16>
    %cst_43 = arith.constant dense<0.000000e+00> : vector<8x128xf32>
    %197 = tpu.matmul %196, %12, %cst_43 {dimension_numbers = #tpu.dot_dimension_numbers<[1], [0], [0], [1], [0, 0, 1, 1], [], []>} : vector<8x32xbf16>, vector<32x128xbf16>, vector<8x128xf32> -> vector<8x128xf32>
    %198 = arith.addf %195, %197 : vector<8x128xf32>
    %199 = vector.extract_strided_slice %198 {offsets = [0, 0], sizes = [8, 96], strides = [1, 1]} : vector<8x128xf32> to vector<8x96xf32>
    %200 = arith.negf %199 : vector<8x96xf32>
    %201 = math.exp %200 : vector<8x96xf32>
    %cst_44 = arith.constant 1.000000e+00 : f32
    %202 = vector.broadcast %cst_44 : f32 to vector<8x96xf32>
    %203 = arith.addf %202, %201 : vector<8x96xf32>
    %204 = arith.divf %202, %203 : vector<8x96xf32>
    %205 = vector.extract_strided_slice %198 {offsets = [0, 96], sizes = [8, 32], strides = [1, 1]} : vector<8x128xf32> to vector<8x32xf32>
    %206 = math.tanh %205 : vector<8x32xf32>
    %207 = vector.extract_strided_slice %204 {offsets = [0, 32], sizes = [8, 32], strides = [1, 1]} : vector<8x96xf32> to vector<8x32xf32>
    %208 = arith.mulf %207, %168 : vector<8x32xf32>
    %209 = vector.extract_strided_slice %204 {offsets = [0, 0], sizes = [8, 32], strides = [1, 1]} : vector<8x96xf32> to vector<8x32xf32>
    %210 = arith.mulf %209, %206 : vector<8x32xf32>
    %211 = arith.addf %208, %210 : vector<8x32xf32>
    %212 = vector.extract_strided_slice %204 {offsets = [0, 64], sizes = [8, 32], strides = [1, 1]} : vector<8x96xf32> to vector<8x32xf32>
    %213 = math.tanh %211 : vector<8x32xf32>
    %214 = arith.mulf %212, %213 : vector<8x32xf32>
    %215 = arith.truncf %214 : vector<8x32xf32> to vector<8x32xbf16>
    %cst_45 = arith.constant dense<0.000000e+00> : vector<8x64xf32>
    %216 = tpu.matmul %215, %13, %cst_45 {dimension_numbers = #tpu.dot_dimension_numbers<[1], [0], [0], [1], [0, 0, 1, 1], [], []>} : vector<8x32xbf16>, vector<32x64xbf16>, vector<8x64xf32> -> vector<8x64xf32>
    %217 = arith.truncf %193 : vector<8x16xf32> to vector<8x16xbf16>
    %cst_46 = arith.constant dense<0.000000e+00> : vector<8x64xf32>
    %218 = tpu.matmul %217, %14, %cst_46 {dimension_numbers = #tpu.dot_dimension_numbers<[1], [0], [0], [1], [0, 0, 1, 1], [], []>} : vector<8x16xbf16>, vector<16x64xbf16>, vector<8x64xf32> -> vector<8x64xf32>
    %219 = arith.addf %216, %218 : vector<8x64xf32>
    %220 = arith.addf %219, %17 : vector<8x64xf32>
    %221 = vector.extract_strided_slice %220 {offsets = [0, 0], sizes = [8, 48], strides = [1, 1]} : vector<8x64xf32> to vector<8x48xf32>
    %222 = arith.negf %221 : vector<8x48xf32>
    %223 = math.exp %222 : vector<8x48xf32>
    %cst_47 = arith.constant 1.000000e+00 : f32
    %224 = vector.broadcast %cst_47 : f32 to vector<8x48xf32>
    %225 = arith.addf %224, %223 : vector<8x48xf32>
    %226 = arith.divf %224, %225 : vector<8x48xf32>
    %227 = vector.extract_strided_slice %220 {offsets = [0, 48], sizes = [8, 16], strides = [1, 1]} : vector<8x64xf32> to vector<8x16xf32>
    %228 = math.tanh %227 : vector<8x16xf32>
    %229 = vector.extract_strided_slice %226 {offsets = [0, 16], sizes = [8, 16], strides = [1, 1]} : vector<8x48xf32> to vector<8x16xf32>
    %230 = arith.mulf %229, %190 : vector<8x16xf32>
    %231 = vector.extract_strided_slice %226 {offsets = [0, 0], sizes = [8, 16], strides = [1, 1]} : vector<8x48xf32> to vector<8x16xf32>
    %232 = arith.mulf %231, %228 : vector<8x16xf32>
    %233 = arith.addf %230, %232 : vector<8x16xf32>
    %234 = vector.extract_strided_slice %226 {offsets = [0, 32], sizes = [8, 16], strides = [1, 1]} : vector<8x48xf32> to vector<8x16xf32>
    %235 = math.tanh %233 : vector<8x16xf32>
    %236 = arith.mulf %234, %235 : vector<8x16xf32>
    %237 = vector.extract_strided_slice %11 {offsets = [5, 0, 0], sizes = [1, 8, 128], strides = [1, 1, 1]} : vector<8x8x128xf32> to vector<1x8x128xf32>
    %238 = vector.shape_cast %237 : vector<1x8x128xf32> to vector<8x128xf32>
    %239 = arith.truncf %214 : vector<8x32xf32> to vector<8x32xbf16>
    %cst_48 = arith.constant dense<0.000000e+00> : vector<8x128xf32>
    %240 = tpu.matmul %239, %12, %cst_48 {dimension_numbers = #tpu.dot_dimension_numbers<[1], [0], [0], [1], [0, 0, 1, 1], [], []>} : vector<8x32xbf16>, vector<32x128xbf16>, vector<8x128xf32> -> vector<8x128xf32>
    %241 = arith.addf %238, %240 : vector<8x128xf32>
    %242 = vector.extract_strided_slice %241 {offsets = [0, 0], sizes = [8, 96], strides = [1, 1]} : vector<8x128xf32> to vector<8x96xf32>
    %243 = arith.negf %242 : vector<8x96xf32>
    %244 = math.exp %243 : vector<8x96xf32>
    %cst_49 = arith.constant 1.000000e+00 : f32
    %245 = vector.broadcast %cst_49 : f32 to vector<8x96xf32>
    %246 = arith.addf %245, %244 : vector<8x96xf32>
    %247 = arith.divf %245, %246 : vector<8x96xf32>
    %248 = vector.extract_strided_slice %241 {offsets = [0, 96], sizes = [8, 32], strides = [1, 1]} : vector<8x128xf32> to vector<8x32xf32>
    %249 = math.tanh %248 : vector<8x32xf32>
    %250 = vector.extract_strided_slice %247 {offsets = [0, 32], sizes = [8, 32], strides = [1, 1]} : vector<8x96xf32> to vector<8x32xf32>
    %251 = arith.mulf %250, %211 : vector<8x32xf32>
    %252 = vector.extract_strided_slice %247 {offsets = [0, 0], sizes = [8, 32], strides = [1, 1]} : vector<8x96xf32> to vector<8x32xf32>
    %253 = arith.mulf %252, %249 : vector<8x32xf32>
    %254 = arith.addf %251, %253 : vector<8x32xf32>
    %255 = vector.extract_strided_slice %247 {offsets = [0, 64], sizes = [8, 32], strides = [1, 1]} : vector<8x96xf32> to vector<8x32xf32>
    %256 = math.tanh %254 : vector<8x32xf32>
    %257 = arith.mulf %255, %256 : vector<8x32xf32>
    %258 = arith.truncf %257 : vector<8x32xf32> to vector<8x32xbf16>
    %cst_50 = arith.constant dense<0.000000e+00> : vector<8x64xf32>
    %259 = tpu.matmul %258, %13, %cst_50 {dimension_numbers = #tpu.dot_dimension_numbers<[1], [0], [0], [1], [0, 0, 1, 1], [], []>} : vector<8x32xbf16>, vector<32x64xbf16>, vector<8x64xf32> -> vector<8x64xf32>
    %260 = arith.truncf %236 : vector<8x16xf32> to vector<8x16xbf16>
    %cst_51 = arith.constant dense<0.000000e+00> : vector<8x64xf32>
    %261 = tpu.matmul %260, %14, %cst_51 {dimension_numbers = #tpu.dot_dimension_numbers<[1], [0], [0], [1], [0, 0, 1, 1], [], []>} : vector<8x16xbf16>, vector<16x64xbf16>, vector<8x64xf32> -> vector<8x64xf32>
    %262 = arith.addf %259, %261 : vector<8x64xf32>
    %263 = arith.addf %262, %17 : vector<8x64xf32>
    %264 = vector.extract_strided_slice %263 {offsets = [0, 0], sizes = [8, 48], strides = [1, 1]} : vector<8x64xf32> to vector<8x48xf32>
    %265 = arith.negf %264 : vector<8x48xf32>
    %266 = math.exp %265 : vector<8x48xf32>
    %cst_52 = arith.constant 1.000000e+00 : f32
    %267 = vector.broadcast %cst_52 : f32 to vector<8x48xf32>
    %268 = arith.addf %267, %266 : vector<8x48xf32>
    %269 = arith.divf %267, %268 : vector<8x48xf32>
    %270 = vector.extract_strided_slice %263 {offsets = [0, 48], sizes = [8, 16], strides = [1, 1]} : vector<8x64xf32> to vector<8x16xf32>
    %271 = math.tanh %270 : vector<8x16xf32>
    %272 = vector.extract_strided_slice %269 {offsets = [0, 16], sizes = [8, 16], strides = [1, 1]} : vector<8x48xf32> to vector<8x16xf32>
    %273 = arith.mulf %272, %233 : vector<8x16xf32>
    %274 = vector.extract_strided_slice %269 {offsets = [0, 0], sizes = [8, 16], strides = [1, 1]} : vector<8x48xf32> to vector<8x16xf32>
    %275 = arith.mulf %274, %271 : vector<8x16xf32>
    %276 = arith.addf %273, %275 : vector<8x16xf32>
    %277 = vector.extract_strided_slice %269 {offsets = [0, 32], sizes = [8, 16], strides = [1, 1]} : vector<8x48xf32> to vector<8x16xf32>
    %278 = math.tanh %276 : vector<8x16xf32>
    %279 = arith.mulf %277, %278 : vector<8x16xf32>
    %280 = vector.extract_strided_slice %11 {offsets = [6, 0, 0], sizes = [1, 8, 128], strides = [1, 1, 1]} : vector<8x8x128xf32> to vector<1x8x128xf32>
    %281 = vector.shape_cast %280 : vector<1x8x128xf32> to vector<8x128xf32>
    %282 = arith.truncf %257 : vector<8x32xf32> to vector<8x32xbf16>
    %cst_53 = arith.constant dense<0.000000e+00> : vector<8x128xf32>
    %283 = tpu.matmul %282, %12, %cst_53 {dimension_numbers = #tpu.dot_dimension_numbers<[1], [0], [0], [1], [0, 0, 1, 1], [], []>} : vector<8x32xbf16>, vector<32x128xbf16>, vector<8x128xf32> -> vector<8x128xf32>
    %284 = arith.addf %281, %283 : vector<8x128xf32>
    %285 = vector.extract_strided_slice %284 {offsets = [0, 0], sizes = [8, 96], strides = [1, 1]} : vector<8x128xf32> to vector<8x96xf32>
    %286 = arith.negf %285 : vector<8x96xf32>
    %287 = math.exp %286 : vector<8x96xf32>
    %cst_54 = arith.constant 1.000000e+00 : f32
    %288 = vector.broadcast %cst_54 : f32 to vector<8x96xf32>
    %289 = arith.addf %288, %287 : vector<8x96xf32>
    %290 = arith.divf %288, %289 : vector<8x96xf32>
    %291 = vector.extract_strided_slice %284 {offsets = [0, 96], sizes = [8, 32], strides = [1, 1]} : vector<8x128xf32> to vector<8x32xf32>
    %292 = math.tanh %291 : vector<8x32xf32>
    %293 = vector.extract_strided_slice %290 {offsets = [0, 32], sizes = [8, 32], strides = [1, 1]} : vector<8x96xf32> to vector<8x32xf32>
    %294 = arith.mulf %293, %254 : vector<8x32xf32>
    %295 = vector.extract_strided_slice %290 {offsets = [0, 0], sizes = [8, 32], strides = [1, 1]} : vector<8x96xf32> to vector<8x32xf32>
    %296 = arith.mulf %295, %292 : vector<8x32xf32>
    %297 = arith.addf %294, %296 : vector<8x32xf32>
    %298 = vector.extract_strided_slice %290 {offsets = [0, 64], sizes = [8, 32], strides = [1, 1]} : vector<8x96xf32> to vector<8x32xf32>
    %299 = math.tanh %297 : vector<8x32xf32>
    %300 = arith.mulf %298, %299 : vector<8x32xf32>
    %301 = arith.truncf %300 : vector<8x32xf32> to vector<8x32xbf16>
    %cst_55 = arith.constant dense<0.000000e+00> : vector<8x64xf32>
    %302 = tpu.matmul %301, %13, %cst_55 {dimension_numbers = #tpu.dot_dimension_numbers<[1], [0], [0], [1], [0, 0, 1, 1], [], []>} : vector<8x32xbf16>, vector<32x64xbf16>, vector<8x64xf32> -> vector<8x64xf32>
    %303 = arith.truncf %279 : vector<8x16xf32> to vector<8x16xbf16>
    %cst_56 = arith.constant dense<0.000000e+00> : vector<8x64xf32>
    %304 = tpu.matmul %303, %14, %cst_56 {dimension_numbers = #tpu.dot_dimension_numbers<[1], [0], [0], [1], [0, 0, 1, 1], [], []>} : vector<8x16xbf16>, vector<16x64xbf16>, vector<8x64xf32> -> vector<8x64xf32>
    %305 = arith.addf %302, %304 : vector<8x64xf32>
    %306 = arith.addf %305, %17 : vector<8x64xf32>
    %307 = vector.extract_strided_slice %306 {offsets = [0, 0], sizes = [8, 48], strides = [1, 1]} : vector<8x64xf32> to vector<8x48xf32>
    %308 = arith.negf %307 : vector<8x48xf32>
    %309 = math.exp %308 : vector<8x48xf32>
    %cst_57 = arith.constant 1.000000e+00 : f32
    %310 = vector.broadcast %cst_57 : f32 to vector<8x48xf32>
    %311 = arith.addf %310, %309 : vector<8x48xf32>
    %312 = arith.divf %310, %311 : vector<8x48xf32>
    %313 = vector.extract_strided_slice %306 {offsets = [0, 48], sizes = [8, 16], strides = [1, 1]} : vector<8x64xf32> to vector<8x16xf32>
    %314 = math.tanh %313 : vector<8x16xf32>
    %315 = vector.extract_strided_slice %312 {offsets = [0, 16], sizes = [8, 16], strides = [1, 1]} : vector<8x48xf32> to vector<8x16xf32>
    %316 = arith.mulf %315, %276 : vector<8x16xf32>
    %317 = vector.extract_strided_slice %312 {offsets = [0, 0], sizes = [8, 16], strides = [1, 1]} : vector<8x48xf32> to vector<8x16xf32>
    %318 = arith.mulf %317, %314 : vector<8x16xf32>
    %319 = arith.addf %316, %318 : vector<8x16xf32>
    %320 = vector.extract_strided_slice %312 {offsets = [0, 32], sizes = [8, 16], strides = [1, 1]} : vector<8x48xf32> to vector<8x16xf32>
    %321 = math.tanh %319 : vector<8x16xf32>
    %322 = arith.mulf %320, %321 : vector<8x16xf32>
    %323 = vector.extract_strided_slice %11 {offsets = [7, 0, 0], sizes = [1, 8, 128], strides = [1, 1, 1]} : vector<8x8x128xf32> to vector<1x8x128xf32>
    %324 = vector.shape_cast %323 : vector<1x8x128xf32> to vector<8x128xf32>
    %325 = arith.truncf %300 : vector<8x32xf32> to vector<8x32xbf16>
    %cst_58 = arith.constant dense<0.000000e+00> : vector<8x128xf32>
    %326 = tpu.matmul %325, %12, %cst_58 {dimension_numbers = #tpu.dot_dimension_numbers<[1], [0], [0], [1], [0, 0, 1, 1], [], []>} : vector<8x32xbf16>, vector<32x128xbf16>, vector<8x128xf32> -> vector<8x128xf32>
    %327 = arith.addf %324, %326 : vector<8x128xf32>
    %328 = vector.extract_strided_slice %327 {offsets = [0, 0], sizes = [8, 96], strides = [1, 1]} : vector<8x128xf32> to vector<8x96xf32>
    %329 = arith.negf %328 : vector<8x96xf32>
    %330 = math.exp %329 : vector<8x96xf32>
    %cst_59 = arith.constant 1.000000e+00 : f32
    %331 = vector.broadcast %cst_59 : f32 to vector<8x96xf32>
    %332 = arith.addf %331, %330 : vector<8x96xf32>
    %333 = arith.divf %331, %332 : vector<8x96xf32>
    %334 = vector.extract_strided_slice %327 {offsets = [0, 96], sizes = [8, 32], strides = [1, 1]} : vector<8x128xf32> to vector<8x32xf32>
    %335 = math.tanh %334 : vector<8x32xf32>
    %336 = vector.extract_strided_slice %333 {offsets = [0, 32], sizes = [8, 32], strides = [1, 1]} : vector<8x96xf32> to vector<8x32xf32>
    %337 = arith.mulf %336, %297 : vector<8x32xf32>
    %338 = vector.extract_strided_slice %333 {offsets = [0, 0], sizes = [8, 32], strides = [1, 1]} : vector<8x96xf32> to vector<8x32xf32>
    %339 = arith.mulf %338, %335 : vector<8x32xf32>
    %340 = arith.addf %337, %339 : vector<8x32xf32>
    %341 = vector.extract_strided_slice %333 {offsets = [0, 64], sizes = [8, 32], strides = [1, 1]} : vector<8x96xf32> to vector<8x32xf32>
    %342 = math.tanh %340 : vector<8x32xf32>
    %343 = arith.mulf %341, %342 : vector<8x32xf32>
    %344 = arith.truncf %343 : vector<8x32xf32> to vector<8x32xbf16>
    %cst_60 = arith.constant dense<0.000000e+00> : vector<8x64xf32>
    %345 = tpu.matmul %344, %13, %cst_60 {dimension_numbers = #tpu.dot_dimension_numbers<[1], [0], [0], [1], [0, 0, 1, 1], [], []>} : vector<8x32xbf16>, vector<32x64xbf16>, vector<8x64xf32> -> vector<8x64xf32>
    %346 = arith.truncf %322 : vector<8x16xf32> to vector<8x16xbf16>
    %cst_61 = arith.constant dense<0.000000e+00> : vector<8x64xf32>
    %347 = tpu.matmul %346, %14, %cst_61 {dimension_numbers = #tpu.dot_dimension_numbers<[1], [0], [0], [1], [0, 0, 1, 1], [], []>} : vector<8x16xbf16>, vector<16x64xbf16>, vector<8x64xf32> -> vector<8x64xf32>
    %348 = arith.addf %345, %347 : vector<8x64xf32>
    %349 = arith.addf %348, %17 : vector<8x64xf32>
    %350 = vector.extract_strided_slice %349 {offsets = [0, 0], sizes = [8, 48], strides = [1, 1]} : vector<8x64xf32> to vector<8x48xf32>
    %351 = arith.negf %350 : vector<8x48xf32>
    %352 = math.exp %351 : vector<8x48xf32>
    %cst_62 = arith.constant 1.000000e+00 : f32
    %353 = vector.broadcast %cst_62 : f32 to vector<8x48xf32>
    %354 = arith.addf %353, %352 : vector<8x48xf32>
    %355 = arith.divf %353, %354 : vector<8x48xf32>
    %356 = vector.extract_strided_slice %349 {offsets = [0, 48], sizes = [8, 16], strides = [1, 1]} : vector<8x64xf32> to vector<8x16xf32>
    %357 = math.tanh %356 : vector<8x16xf32>
    %358 = vector.extract_strided_slice %355 {offsets = [0, 16], sizes = [8, 16], strides = [1, 1]} : vector<8x48xf32> to vector<8x16xf32>
    %359 = arith.mulf %358, %319 : vector<8x16xf32>
    %360 = vector.extract_strided_slice %355 {offsets = [0, 0], sizes = [8, 16], strides = [1, 1]} : vector<8x48xf32> to vector<8x16xf32>
    %361 = arith.mulf %360, %357 : vector<8x16xf32>
    %362 = arith.addf %359, %361 : vector<8x16xf32>
    %363 = vector.extract_strided_slice %355 {offsets = [0, 32], sizes = [8, 16], strides = [1, 1]} : vector<8x48xf32> to vector<8x16xf32>
    %364 = math.tanh %362 : vector<8x16xf32>
    %365 = arith.mulf %363, %364 : vector<8x16xf32>
    %c0_63 = arith.constant 0 : index
    %c0_64 = arith.constant 0 : index
    %366 = vector.load %arg10[%c0_63, %c0_64] : memref<8x32xf32, #tpu.memory_space<vmem>>, vector<8x32xf32>
    tpu.vector_store %arg10[%c0_63, %c0_64], %343 {strides = array<i32>} : memref<8x32xf32, #tpu.memory_space<vmem>>, vector<8x32xf32>,
    %c0_65 = arith.constant 0 : index
    %c0_66 = arith.constant 0 : index
    %367 = vector.load %arg11[%c0_65, %c0_66] : memref<8x32xf32, #tpu.memory_space<vmem>>, vector<8x32xf32>
    tpu.vector_store %arg11[%c0_65, %c0_66], %340 {strides = array<i32>} : memref<8x32xf32, #tpu.memory_space<vmem>>, vector<8x32xf32>,
    %c0_67 = arith.constant 0 : index
    %c0_68 = arith.constant 0 : index
    %368 = vector.load %arg12[%c0_67, %c0_68] : memref<8x16xf32, #tpu.memory_space<vmem>>, vector<8x16xf32>
    tpu.vector_store %arg12[%c0_67, %c0_68], %365 {strides = array<i32>} : memref<8x16xf32, #tpu.memory_space<vmem>>, vector<8x16xf32>,
    %c0_69 = arith.constant 0 : index
    %c0_70 = arith.constant 0 : index
    %369 = vector.load %arg13[%c0_69, %c0_70] : memref<8x16xf32, #tpu.memory_space<vmem>>, vector<8x16xf32>
    tpu.vector_store %arg13[%c0_69, %c0_70], %362 {strides = array<i32>} : memref<8x16xf32, #tpu.memory_space<vmem>>, vector<8x16xf32>,
    %370 = tpu.concatenate %64, %107, %150, %193, %236, %279, %322, %365 in 1 : vector<8x16xf32>, vector<8x16xf32>, vector<8x16xf32>, vector<8x16xf32>, vector<8x16xf32>, vector<8x16xf32>, vector<8x16xf32>, vector<8x16xf32> -> vector<8x128xf32>
    %c0_71 = arith.constant 0 : index
    %c0_72 = arith.constant 0 : index
    %371 = vector.load %arg9[%c0_71, %c0_72] : memref<8x128xf32, #tpu.memory_space<vmem>>, vector<8x128xf32>
    tpu.vector_store %arg9[%c0_71, %c0_72], %370 {strides = array<i32>} : memref<8x128xf32, #tpu.memory_space<vmem>>, vector<8x128xf32>,
    return
  }
  func.func @transform_0(%arg0: i32, %arg1: i32) -> (i32, i32, i32) {
    %c0_i32 = arith.constant 0 : i32
    %c0_i32_0 = arith.constant 0 : i32
    return %arg1, %arg0, %c0_i32 : i32, i32, i32
  }
  func.func @transform_1(%arg0: i32, %arg1: i32) -> (i32, i32) {
    %c0_i32 = arith.constant 0 : i32
    %c0_i32_0 = arith.constant 0 : i32
    %c0_i32_1 = arith.constant 0 : i32
    return %c0_i32, %c0_i32_0 : i32, i32
  }
  func.func @transform_2(%arg0: i32, %arg1: i32) -> (i32, i32) {
    %c0_i32 = arith.constant 0 : i32
    %c0_i32_0 = arith.constant 0 : i32
    %c0_i32_1 = arith.constant 0 : i32
    return %c0_i32, %c0_i32_0 : i32, i32
  }
  func.func @transform_3(%arg0: i32, %arg1: i32) -> (i32, i32) {
    %c0_i32 = arith.constant 0 : i32
    %c0_i32_0 = arith.constant 0 : i32
    %c0_i32_1 = arith.constant 0 : i32
    return %c0_i32, %c0_i32_0 : i32, i32
  }
  func.func @transform_4(%arg0: i32, %arg1: i32) -> (i32, i32) {
    %c0_i32 = arith.constant 0 : i32
    %c0_i32_0 = arith.constant 0 : i32
    %c0_i32_1 = arith.constant 0 : i32
    return %c0_i32, %c0_i32_0 : i32, i32
  }
  func.func @transform_5(%arg0: i32, %arg1: i32) -> (i32, i32) {
    %c0_i32 = arith.constant 0 : i32
    %c0_i32_0 = arith.constant 0 : i32
    %c0_i32_1 = arith.constant 0 : i32
    return %c0_i32, %c0_i32_0 : i32, i32
  }
  func.func @transform_6(%arg0: i32, %arg1: i32) -> (i32, i32) {
    %c0_i32 = arith.constant 0 : i32
    %c0_i32_0 = arith.constant 0 : i32
    %c0_i32_1 = arith.constant 0 : i32
    return %c0_i32, %c0_i32_0 : i32, i32
  }
  func.func @transform_7(%arg0: i32, %arg1: i32) -> (i32, i32) {
    %c0_i32 = arith.constant 0 : i32
    return %arg0, %arg1 : i32, i32
  }
}

</mosaic_0001>

<bundles_post_ra>
// kernel: lstm_encoder_forward.1
= control target key start
LH: loop header
LB: loop body
LE: loop exit
PB: predicated region body
PF: predicated region fallthrough
CT: control target
= control target key end

     0   :  { %vm70_vm0 = vcmask 1041408   ;;  %v2192_v1 = vmov 0.0   ;;  %vm2193_vm1 = vmmov 0   ;;  %vm57_vm2 = vcmask 31744   ;;  %s2194_s16 = smov 32   ;;  %s2196_s9 = smov 80   ;;  %s2680_s1 = inlined_call_operand.vmem [shape: bf16[4,128], index: 1, kind: input, shape index: {}]   ;;  %s2681_s3 = inlined_call_operand.vmem [shape: bf16[32,128], index: 3, kind: input, shape index: {}]   ;;  %s2682_s0 = inlined_call_operand.vmem [shape: f32[8,8,4], index: 0, kind: input, shape index: {}]   ;;  %s2683_s2 = inlined_call_operand.vmem [shape: f32[1,128], index: 2, kind: input, shape index: {}]   ;;  %s2684_s4 = inlined_call_operand.vmem [shape: bf16[32,64], index: 4, kind: input, shape index: {}]   ;;  %s2685_s5 = inlined_call_operand.vmem [shape: bf16[16,64], index: 5, kind: input, shape index: {}]   ;;  %s2686_s6 = inlined_call_operand.vmem [shape: f32[1,64], index: 6, kind: input, shape index: {}]   ;;  %s2687_s7 = inlined_call_operand.vmem [shape: f32[8,128], index: 7, kind: output, shape index: {}]  }
   0x1   :  { %v49_v0 = vld [vmem:[%s2680_s1] sm:$0x3]  ;;  %1867 = vmatprep.subr.bf16.mxu1 %v2192_v1  ;;  %1871 = vmatprep.mubr.msk.bf16.mxu1 %vm2193_vm1, %v2192_v1  ;;  %v38_v5 = vld [vmem:[%s2682_s0 + $0x8] sm:$0xff]  ;;  %vm31_vm3 = vcmask 261120   ;;  %v39_v7 = vld [vmem:[%s2682_s0 + $0x10] sm:$0xff]  ;;  %vm34_vm4 = vcmask 130048  }
   0x2   :  { %2043 = vmatprep.subr.msk.bf16.mxu0 %vm70_vm0, %v49_v0  ;;  %v72_v2 = vsel %vm70_vm0, %v49_v0, 0  ;;  %v2250_v3 = vld [vmem:[%s2681_s3] sm:$0xff]   ;;  %v40_v8 = vld [vmem:[%s2682_s0 + $0x18] sm:$0xff]  ;;  %32 = vst.msk [vmem:[#allocation2] sm:$0xff] %vm31_vm3, %v2192_v1  ;;  %33 = vst.msk [vmem:[#allocation3] sm:$0xff] %vm31_vm3, %v2192_v1  ;;  %s2197_s10 = smov 16  }
   0x3   :  { %v37_v4 = vld [vmem:[%s2682_s0] sm:$0xff]  ;;  %1858 = vmatpush3.bf16.msra.mxu0 %v72_v2  ;;  %1868 = vmatpush3.bf16.msra.mxu1 %v2250_v3  ;;  %v46_v9 = vpack.c.bf16 %v40_v8, %v39_v7  ;;  %v2272_v10 = vld [vmem:[%s2681_s3 + $0x8] sm:$0xff]   ;;  %v43_v38 = vld [vmem:[%s2682_s0 + $0x30] sm:$0xff]  ;;  %35 = vst.msk [vmem:[#allocation4] sm:$0xff] %vm34_vm4, %v2192_v1  ;;  %s2198_s11 = smov 96   ;;  %s2200_s21 = smov 112  }
   0x4   :  { %v45_v6 = vpack.c.bf16 %v38_v5, %v37_v4  ;;  %1881 = vmatprep.subr.bf16.mxu0 %v2192_v1  ;;  %1869 = vmatprep.subr.bf16.mxu1 %v2192_v1  ;;  %v2288_v14 = vld [vmem:[%s2683_s2] ss:$0 sm:$0xff]  ;;  %v42_v37 = vld [vmem:[%s2682_s0 + $0x28] sm:$0xff]  ;;  %36 = vst.msk [vmem:[#allocation5] sm:$0xff] %vm34_vm4, %v2192_v1  ;;  %v44_v42 = vld [vmem:[%s2682_s0 + $0x38] sm:$0xff]  ;;  %vm1722_vm5 = vcmask 392192  }
   0x5   :  { %v41_v36 = vld [vmem:[%s2682_s0 + $0x20] sm:$0xff]  ;;  %v48_v43 = vpack.c.bf16 %v44_v42, %v43_v38  ;;  %v2334_v44 = vld [vmem:[%s2684_s4 + $0x8] sm:$0xff]   ;;  %s2195_s0 = smov 64   ;;  %vm1724_vm6 = vcmask 523264   ;;  %vm1726_vm7 = vcmask 654336   ;;  %vm1728_vm8 = vcmask 785408  }
   0x6   :  { %1859 = vmatprep.mubr.msk.bf16.mxu0 %vm57_vm2, %v45_v6  ;;  %v2313_v39 = vld [vmem:[%s2684_s4] sm:$0xff]   ;;  %v47_v40 = vpack.c.bf16 %v42_v37, %v41_v36  ;;  %vm1730_vm9 = vcmask 916480  }
   0x7   :  { %1860 = vmatmul.mubr.msk.bf16.vlgmr.msra.gmra.mrb[0].mxu0 %vm57_vm2, %v46_v9  ;;  %1870 = vmatpush3.bf16.msra.mxu1 %v2272_v10  ;;  %v2322_v41 = vld [vmem:[%s2685_s5] sm:$0xff]  }
   0x8   :  { %1875 = vmatprep.subr.bf16.mxu1 %v2192_v1  ;;  %1882 = vmatpush3.bf16.msra.mxu0 %v2313_v39  ;;  %v2376_v61 = vld [vmem:[%s2686_s6] ss:$0 sm:$0xff] }
   0x9   :  { %v156_v11 = vld [vmem:[#allocation2] sm:$0xff]  ;;  %v157_v25 = vld [vmem:[#allocation3] sm:$0xff]  ;;  %1863 = vmatprep.mubr.msk.bf16.mxu0 %vm57_vm2, %v47_v40  ;;  %1883 = vmatprep.subr.bf16.mxu0 %v2192_v1 }
   0xa   :  { %v160_v12 = vpack.c.bf16 %v156_v11, %v156_v11  ;;  %v158_v46 = vld [vmem:[#allocation4] sm:$0xff] }
   0xb   :  { %v247_v47 = vpack.c.bf16 %v158_v46, %v158_v46 }
   0xc   :  { %1872 = vmatmul.mubr.msk.bf16.vlgmr.msra.gmra.mrb[0].mxu1 %vm31_vm3, %v160_v12  ;;  %1884 = vmatpush3.bf16.msra.mxu0 %v2334_v44 }
   0xd   :  { %1877 = vmatprep.mubr.msk.bf16.mxu1 %vm2193_vm1, %v2192_v1  ;;  %1876 = vmatpush3.bf16.msra.mxu1 %v2322_v41 }
   0xe   :  { %1889 = vmatprep.subr.bf16.mxu1 %v2192_v1  ;;  %1897 = vmatprep.subr.bf16.mxu0 %v2192_v1 }
   0xf   :  { %1864 = vmatmul.mubr.msk.bf16.gmra.mrb[4].mxu0 %vm57_vm2, %v48_v43 }
  0x10   :  { %1885 = vmatprep.mubr.msk.bf16.mxu0 %vm2193_vm1, %v2192_v1 }
  0x14   :  { %1878 = vmatmul.mubr.msk.bf16.vlgmr.msra.gmra.mrb[4].mxu1 %vm34_vm4, %v247_v47 }
  0x15   :  { %1890 = vmatpush3.bf16.msra.mxu1 %v2250_v3  ;;  %1893 = vmatprep.mubr.msk.bf16.mxu1 %vm2193_vm1, %v2192_v1 }
  0x16   :  { %1891 = vmatprep.subr.bf16.mxu1 %v2192_v1 }
  0x19   :  { %1892 = vmatpush3.bf16.msra.mxu1 %v2272_v10 }
  0x1a   :  { %1903 = vmatprep.subr.bf16.mxu1 %v2192_v1 }
  0xda   :  { %v2283_v13 = vpop.f32.mrb[0].mxu0 }
  0xdb   :  { %v108_v15 = vpop.f32.mrb[1].mxu0 }
  0xdc   :  { %v2290_v16 = vpop.f32.mrb[2].mxu0  ;;  %v109_v18 = vadd.f32 %v2288_v14, %v108_v15 }
  0xdd   :  { %v2292_v17 = vpop.f32.mrb[3].mxu0 }
  0xde   :  { %v112_v60 = vadd.f32 %v2288_v14, %v2292_v17  ;;  %v159_v17 = vld [vmem:[#allocation5] sm:$0xff] }
  0xdf   :  { %v211_v19 = vpop.f32.mrb[0].mxu1 }
  0xe0   :  { %v217_v20 = vadd.f32 %v211_v19, %v109_v18  ;;  %v1873_v21 = vpop.f32.mrb[1].mxu1 }
  0xe1   :  { %v214_v22 = vpop.f32.mrb[2].mxu1 }
  0xe2   :  { %2058 = vtanh.f32 %v217_v20  ;;  %v1874_v23 = vpop.f32.mrb[3].mxu1  ;;  %v1746_v26 = vmul.f32 -1.442695, %v217_v20  ;;  %v2351_v51 = vpop.f32.mrb[4].mxu0 }
  0xe3   :  { %v2353_v52 = vpop.f32.mrb[5].mxu0 }
  0xe4   :  { %2060 = vpow2.f32 %v1746_v26  ;;  %v2355_v53 = vpop.f32.mrb[6].mxu0 }
  0xe5   :  { %v2357_v54 = vpop.f32.mrb[7].mxu0 }
  0xe7   :  { %v292_v55 = vpop.f32.mrb[4].mxu1 }
  0xe8   :  { %v1879_v56 = vpop.f32.mrb[5].mxu1 }
  0xe9   :  { %v295_v57 = vpop.f32.mrb[6].mxu1 }
  0xea   :  { %v1880_v58 = vpop.f32.mrb[7].mxu1 }
  0xec   :  { %v2059_v24 = vpop.eup %2058 }
  0xed   :  { %231 = vrot.lane.b32.xlu0 %v2059_v24, %s2194_s16 }
  0xee   :  { %v2061_v27 = vpop.eup %2060 }
  0xef   :  { %v221_v28 = vadd.f32 1.0, %v2061_v27 }
  0xf1   :  { %226 = vrot.lane.b32.xlu0 %v157_v25, %s2194_s16  ;;  %2062 = vrcp.f32 %v221_v28 }
  0xfb   :  { %v2063_v29 = vpop.eup %2062 }
 0x15f   :  { %v232_v30 = vpop.permute.xlu0 %231 }
 0x160   :  { %v234_v31 = vmul.f32 %v2063_v29, %v232_v30 }
 0x162   :  { %236 = vrot.lane.b32.xlu1 %v234_v31, %s2194_s16 }
 0x163   :  { %v227_v32 = vpop.permute.xlu0 %226 }
 0x164   :  { %v229_v33 = vmul.f32 %v2063_v29, %v227_v32 }
 0x1d4   :  { %v237_v34 = vpop.permute.xlu1 %236 }
 0x1d5   :  { %v2298_v35 = vadd.f32 %v237_v34, %v229_v33 }
 0x1d7   :  { %2064 = vtanh.f32 %v2298_v35 }
 0x1e1   :  { %v2065_v45 = vpop.eup %2064 }
 0x1e2   :  { %242 = vrot.lane.b32.xlu1 %v2065_v45, %s2194_s16 }
 0x254   :  { %v243_v48 = vpop.permute.xlu1 %242 }
 0x255   :  { %v245_v49 = vmul.f32 %v2063_v29, %v243_v48 }
 0x257   :  { %v246_v50 = vpack.c.bf16 %v245_v49, %v245_v49 }
 0x259   :  { %299 = vrot.lane.b32.xlu0 %v246_v50, %s2195_s0 }
 0x2cb   :  { %v300_v59 = vpop.permute.xlu0 %299 }
 0x2cc   :  { %1886 = vmatmul.mubr.msk.bf16.vlgmr.msra.gmra.mrb[8].mxu0 %vm31_vm3, %v300_v59  ;;  %1894 = vmatmul.mubr.msk.bf16.vlgmr.msra.gmra.mrb[8].mxu1 %vm31_vm3, %v300_v59 }
 0x2cd   :  { %1904 = vmatpush3.bf16.msra.mxu1 %v2313_v39  ;;  %1898 = vmatpush3.bf16.msra.mxu0 %v2322_v41 }
 0x2ce   :  { %1905 = vmatprep.subr.bf16.mxu1 %v2192_v1  ;;  %1907 = vmatprep.mubr.msk.bf16.mxu1 %vm2193_vm1, %v2192_v1 }
 0x2cf   :  { %1899 = vmatprep.mubr.msk.bf16.mxu0 %vm2193_vm1, %v2192_v1  ;;  %1911 = vmatprep.subr.bf16.mxu0 %v2192_v1 }
 0x2d1   :  { %1906 = vmatpush3.bf16.msra.mxu1 %v2334_v44 }
 0x2d2   :  { %1919 = vmatprep.subr.bf16.mxu1 %v2192_v1 }
 0x39f   :  { %v350_v62 = vpop.f32.mrb[8].mxu0  ;;  %v419_v63 = vpop.f32.mrb[8].mxu1 }
 0x3a0   :  { %v351_v0 = vadd.f32 %v350_v62, %v292_v55  ;;  %v425_v2 = vadd.f32 %v419_v63, %v112_v60  ;;  %v1887_v4 = vpop.f32.mrb[9].mxu0  ;;  %v1895_v5 = vpop.f32.mrb[9].mxu1 }
 0x3a1   :  { %v353_v6 = vpop.f32.mrb[10].mxu0  ;;  %v422_v7 = vpop.f32.mrb[10].mxu1 }
 0x3a2   :  { %v356_v8 = vadd.f32 %v2376_v61, %v351_v0  ;;  %2066 = vtanh.f32 %v425_v2  ;;  %v1888_v9 = vpop.f32.mrb[11].mxu0  ;;  %v1896_v11 = vpop.f32.mrb[11].mxu1  ;;  %v1754_v18 = vmul.f32 -1.442695, %v425_v2  ;;  %v117_v2 = vadd.f32 %v2283_v13, %v2288_v14 }
 0x3a4   :  { %2068 = vtanh.f32 %v356_v8  ;;  %v1752_v19 = vmul.f32 -1.442695, %v356_v8 }
 0x3a5   :  { %2070 = vpow2.f32 %v1754_v18 }
 0x3a6   :  { %2072 = vpow2.f32 %v1752_v19 }
 0x3ac   :  { %v2067_v12 = vpop.eup %2066 }
 0x3ad   :  { %435 = vrot.lane.b32.xlu0 %v2067_v12, %s2194_s16 }
 0x3ae   :  { %v2069_v15 = vpop.eup %2068 }
 0x3af   :  { %370 = vrot.lane.b32.xlu1 %v2069_v15, %s2196_s9  ;;  %v2071_v20 = vpop.eup %2070 }
 0x3b0   :  { %v2073_v21 = vpop.eup %2072  ;;  %v429_v22 = vadd.f32 1.0, %v2071_v20 }
 0x3b1   :  { %v360_v23 = vadd.f32 1.0, %v2073_v21 }
 0x3b2   :  { %2074 = vrcp.f32 %v429_v22 }
 0x3b3   :  { %365 = vrot.lane.b32.xlu1 %v159_v17, %s2197_s10  ;;  %2076 = vrcp.f32 %v360_v23 }
 0x3bc   :  { %v2075_v24 = vpop.eup %2074 }
 0x3bd   :  { %v2077_v27 = vpop.eup %2076  ;;  %v433_v31 = vmul.f32 %v2075_v24, %v2298_v35 }
 0x41f   :  { %v436_v25 = vpop.permute.xlu0 %435 }
 0x420   :  { %v438_v26 = vmul.f32 %v2075_v24, %v436_v25 }
 0x421   :  { %v371_v28 = vpop.permute.xlu1 %370 }
 0x422   :  { %v373_v29 = vmul.f32 %v2077_v27, %v371_v28  ;;  %440 = vrot.lane.b32.xlu1 %v438_v26, %s2194_s16 }
 0x424   :  { %375 = vrot.lane.b32.xlu0 %v373_v29, %s2197_s10 }
 0x425   :  { %v366_v30 = vpop.permute.xlu1 %365 }
 0x426   :  { %v368_v33 = vmul.f32 %v2077_v27, %v366_v30 }
 0x494   :  { %v441_v32 = vpop.permute.xlu1 %440 }
 0x495   :  { %v2385_v34 = vadd.f32 %v441_v32, %v433_v31 }
 0x496   :  { %v376_v36 = vpop.permute.xlu0 %375 }
 0x497   :  { %2078 = vtanh.f32 %v2385_v34  ;;  %v2388_v37 = vadd.f32 %v376_v36, %v368_v33 }
 0x499   :  { %2080 = vtanh.f32 %v2388_v37 }
 0x4a1   :  { %v2079_v38 = vpop.eup %2078 }
 0x4a2   :  { %446 = vrot.lane.b32.xlu1 %v2079_v38, %s2194_s16 }
 0x4a3   :  { %v2081_v40 = vpop.eup %2080 }
 0x4a4   :  { %381 = vrot.lane.b32.xlu0 %v2081_v40, %s2197_s10 }
 0x514   :  { %v447_v42 = vpop.permute.xlu1 %446 }
 0x515   :  { %v449_v43 = vmul.f32 %v2075_v24, %v447_v42 }
 0x516   :  { %v382_v35 = vpop.permute.xlu0 %381 }
 0x517   :  { %v450_v45 = vpack.c.bf16 %v449_v43, %v449_v43  ;;  %v2393_v46 = vmul.f32 %v2077_v27, %v382_v35 }
 0x519   :  { %v451_v47 = vpack.c.bf16 %v2393_v46, %v2393_v46  ;;  %499 = vrot.lane.b32.xlu1 %v450_v45, %s2195_s0 }
 0x51b   :  { %453 = vrot.lane.b32.xlu0 %v451_v47, %s2198_s11 }
 0x58b   :  { %v500_v48 = vpop.permute.xlu1 %499 }
 0x58c   :  { %1908 = vmatmul.mubr.msk.bf16.vlgmr.msra.gmra.mrb[12].mxu1 %vm31_vm3, %v500_v48 }
 0x58d   :  { %v454_v49 = vpop.permute.xlu0 %453  ;;  %1920 = vmatpush3.bf16.msra.mxu1 %v2322_v41  ;;  %1921 = vmatprep.mubr.msk.bf16.mxu1 %vm2193_vm1, %v2192_v1 }
 0x58e   :  { %1900 = vmatmul.mubr.msk.bf16.vlgmr.msra.gmra.mrb[12].mxu0 %vm34_vm4, %v454_v49  ;;  %1933 = vmatprep.subr.bf16.mxu1 %v2192_v1 }
 0x58f   :  { %1912 = vmatpush3.bf16.msra.mxu0 %v2250_v3  ;;  %1915 = vmatprep.mubr.msk.bf16.mxu0 %vm2193_vm1, %v2192_v1 }
 0x590   :  { %1913 = vmatprep.subr.bf16.mxu0 %v2192_v1 }
 0x593   :  { %1914 = vmatpush3.bf16.msra.mxu0 %v2272_v10 }
 0x594   :  { %1925 = vmatprep.subr.bf16.mxu0 %v2192_v1 }
 0x596   :  { %1916 = vmatmul.mubr.msk.bf16.vlgmr.msra.gmra.mrb[16].mxu0 %vm31_vm3, %v500_v48 }
 0x597   :  { %1926 = vmatpush3.bf16.msra.mxu0 %v2313_v39  ;;  %1929 = vmatprep.mubr.msk.bf16.mxu0 %vm2193_vm1, %v2192_v1 }
 0x598   :  { %1927 = vmatprep.subr.bf16.mxu0 %v2192_v1 }
 0x59b   :  { %1928 = vmatpush3.bf16.msra.mxu0 %v2334_v44 }
 0x59c   :  { %1941 = vmatprep.subr.bf16.mxu0 %v2192_v1 }
 0x65f   :  { %v538_v50 = vpop.f32.mrb[12].mxu1 }
 0x660   :  { %v1909_v55 = vpop.f32.mrb[13].mxu1 }
 0x661   :  { %v492_v56 = vpop.f32.mrb[12].mxu0  ;;  %v541_v57 = vpop.f32.mrb[14].mxu1  ;;  %v120_v55 = vadd.f32 %v2290_v16, %v2288_v14 }
 0x662   :  { %v539_v58 = vadd.f32 %v538_v50, %v492_v56  ;;  %v1901_v59 = vpop.f32.mrb[13].mxu0  ;;  %v1910_v60 = vpop.f32.mrb[15].mxu1 }
 0x663   :  { %v495_v62 = vpop.f32.mrb[14].mxu0 }
 0x664   :  { %v544_v63 = vadd.f32 %v2376_v61, %v539_v58  ;;  %v1902_v0 = vpop.f32.mrb[15].mxu0 }
 0x666   :  { %2082 = vtanh.f32 %v544_v63  ;;  %v1757_v12 = vmul.f32 -1.442695, %v544_v63 }
 0x669   :  { %v603_v4 = vpop.f32.mrb[16].mxu0 }
 0x66a   :  { %v609_v5 = vadd.f32 %v603_v4, %v117_v2  ;;  %v1917_v6 = vpop.f32.mrb[17].mxu0 }
 0x66b   :  { %v606_v7 = vpop.f32.mrb[18].mxu0 }
 0x66c   :  { %2084 = vtanh.f32 %v609_v5  ;;  %v1918_v8 = vpop.f32.mrb[19].mxu0  ;;  %v1759_v15 = vmul.f32 -1.442695, %v609_v5 }
 0x66d   :  { %2086 = vpow2.f32 %v1757_v12 }
 0x66e   :  { %2088 = vpow2.f32 %v1759_v15 }
 0x670   :  { %v2083_v9 = vpop.eup %2082 }
 0x671   :  { %554 = vrot.lane.b32.xlu0 %v2083_v9, %s2196_s9 }
 0x676   :  { %v2085_v11 = vpop.eup %2084 }
 0x677   :  { %619 = vrot.lane.b32.xlu1 %v2085_v11, %s2194_s16  ;;  %v2087_v17 = vpop.eup %2086 }
 0x678   :  { %v548_v18 = vadd.f32 1.0, %v2087_v17  ;;  %v2089_v19 = vpop.eup %2088 }
 0x679   :  { %v613_v13 = vadd.f32 1.0, %v2089_v19 }
 0x67a   :  { %2090 = vrcp.f32 %v548_v18 }
 0x67b   :  { %2092 = vrcp.f32 %v613_v13 }
 0x684   :  { %v2091_v20 = vpop.eup %2090 }
 0x685   :  { %v2093_v23 = vpop.eup %2092  ;;  %v552_v26 = vmul.f32 %v2091_v20, %v2388_v37 }
 0x686   :  { %v617_v29 = vmul.f32 %v2093_v23, %v2385_v34 }
 0x6e3   :  { %v555_v21 = vpop.permute.xlu0 %554 }
 0x6e4   :  { %v557_v22 = vmul.f32 %v2091_v20, %v555_v21 }
 0x6e6   :  { %559 = vrot.lane.b32.xlu0 %v557_v22, %s2197_s10 }
 0x6e9   :  { %v620_v24 = vpop.permute.xlu1 %619 }
 0x6ea   :  { %v622_v25 = vmul.f32 %v2093_v23, %v620_v24 }
 0x6ec   :  { %624 = vrot.lane.b32.xlu1 %v622_v25, %s2194_s16 }
 0x758   :  { %v560_v27 = vpop.permute.xlu0 %559 }
 0x759   :  { %v2426_v28 = vadd.f32 %v560_v27, %v552_v26 }
 0x75b   :  { %2094 = vtanh.f32 %v2426_v28 }
 0x75e   :  { %v625_v30 = vpop.permute.xlu1 %624 }
 0x75f   :  { %v2430_v31 = vadd.f32 %v625_v30, %v617_v29 }
 0x761   :  { %2096 = vtanh.f32 %v2430_v31 }
 0x765   :  { %v2095_v32 = vpop.eup %2094 }
 0x766   :  { %565 = vrot.lane.b32.xlu0 %v2095_v32, %s2197_s10 }
 0x76b   :  { %v2097_v33 = vpop.eup %2096 }
 0x76c   :  { %630 = vrot.lane.b32.xlu1 %v2097_v33, %s2194_s16 }
 0x7d8   :  { %v566_v36 = vpop.permute.xlu0 %565 }
 0x7d9   :  { %v2435_v37 = vmul.f32 %v2091_v20, %v566_v36 }
 0x7db   :  { %v635_v38 = vpack.c.bf16 %v2435_v37, %v2435_v37 }
 0x7dd   :  { %637 = vrot.lane.b32.xlu0 %v635_v38, %s2198_s11 }
 0x7de   :  { %v631_v34 = vpop.permute.xlu1 %630 }
 0x7df   :  { %v633_v40 = vmul.f32 %v2093_v23, %v631_v34 }
 0x7e1   :  { %v634_v42 = vpack.c.bf16 %v633_v40, %v633_v40 }
 0x7e3   :  { %683 = vrot.lane.b32.xlu1 %v634_v42, %s2195_s0 }
 0x84f   :  { %v638_v43 = vpop.permute.xlu0 %637 }
 0x850   :  { %1922 = vmatmul.mubr.msk.bf16.vlgmr.msra.gmra.mrb[16].mxu1 %vm34_vm4, %v638_v43 }
 0x851   :  { %1934 = vmatpush3.bf16.msra.mxu1 %v2250_v3  ;;  %1937 = vmatprep.mubr.msk.bf16.mxu1 %vm2193_vm1, %v2192_v1 }
 0x852   :  { %1935 = vmatprep.subr.bf16.mxu1 %v2192_v1 }
 0x855   :  { %1936 = vmatpush3.bf16.msra.mxu1 %v2272_v10  ;;  %v684_v35 = vpop.permute.xlu1 %683 }
 0x856   :  { %1930 = vmatmul.mubr.msk.bf16.vlgmr.msra.gmra.mrb[20].mxu0 %vm31_vm3, %v684_v35  ;;  %1947 = vmatprep.subr.bf16.mxu1 %v2192_v1 }
 0x857   :  { %1942 = vmatpush3.bf16.msra.mxu0 %v2322_v41  ;;  %1943 = vmatprep.mubr.msk.bf16.mxu0 %vm2193_vm1, %v2192_v1 }
 0x858   :  { %1938 = vmatmul.mubr.msk.bf16.vlgmr.msra.gmra.mrb[20].mxu1 %vm31_vm3, %v684_v35  ;;  %1955 = vmatprep.subr.bf16.mxu0 %v2192_v1 }
 0x859   :  { %1948 = vmatpush3.bf16.msra.mxu1 %v2313_v39  ;;  %1951 = vmatprep.mubr.msk.bf16.mxu1 %vm2193_vm1, %v2192_v1 }
 0x85a   :  { %1949 = vmatprep.subr.bf16.mxu1 %v2192_v1 }
 0x85d   :  { %1950 = vmatpush3.bf16.msra.mxu1 %v2334_v44 }
 0x85e   :  { %1963 = vmatprep.subr.bf16.mxu1 %v2192_v1 }
 0x923   :  { %v676_v45 = vpop.f32.mrb[16].mxu1 }
 0x924   :  { %v1923_v47 = vpop.f32.mrb[17].mxu1 }
 0x925   :  { %v679_v48 = vpop.f32.mrb[18].mxu1 }
 0x926   :  { %v1924_v49 = vpop.f32.mrb[19].mxu1 }
 0x929   :  { %v722_v50 = vpop.f32.mrb[20].mxu0 }
 0x92a   :  { %v723_v56 = vadd.f32 %v722_v50, %v676_v45  ;;  %v1931_v57 = vpop.f32.mrb[21].mxu0 }
 0x92b   :  { %v725_v58 = vpop.f32.mrb[22].mxu0  ;;  %v787_v59 = vpop.f32.mrb[20].mxu1 }
 0x92c   :  { %v728_v60 = vadd.f32 %v2376_v61, %v723_v56  ;;  %v793_v62 = vadd.f32 %v787_v59, %v120_v55  ;;  %v1932_v63 = vpop.f32.mrb[23].mxu0  ;;  %v1939_v0 = vpop.f32.mrb[21].mxu1  ;;  %v125_v56 = vadd.f32 %v2288_v14, %v2353_v52 }
 0x92d   :  { %v790_v2 = vpop.f32.mrb[22].mxu1 }
 0x92e   :  { %2098 = vtanh.f32 %v728_v60  ;;  %v1940_v4 = vpop.f32.mrb[23].mxu1  ;;  %v1762_v16 = vmul.f32 -1.442695, %v728_v60  ;;  %v1764_v7 = vmul.f32 -1.442695, %v793_v62 }
 0x92f   :  { %2100 = vtanh.f32 %v793_v62 }
 0x930   :  { %2102 = vpow2.f32 %v1762_v16 }
 0x931   :  { %2104 = vpow2.f32 %v1764_v7 }
 0x938   :  { %v2099_v5 = vpop.eup %2098 }
 0x939   :  { %v2101_v6 = vpop.eup %2100  ;;  %738 = vrot.lane.b32.xlu0 %v2099_v5, %s2196_s9 }
 0x93a   :  { %803 = vrot.lane.b32.xlu1 %v2101_v6, %s2194_s16  ;;  %v2103_v8 = vpop.eup %2102 }
 0x93b   :  { %v2105_v9 = vpop.eup %2104  ;;  %v732_v11 = vadd.f32 1.0, %v2103_v8 }
 0x93c   :  { %v797_v12 = vadd.f32 1.0, %v2105_v9 }
 0x93d   :  { %2106 = vrcp.f32 %v732_v11 }
 0x93e   :  { %2108 = vrcp.f32 %v797_v12 }
 0x947   :  { %v2107_v15 = vpop.eup %2106 }
 0x948   :  { %v2109_v18 = vpop.eup %2108  ;;  %v736_v21 = vmul.f32 %v2107_v15, %v2426_v28 }
 0x949   :  { %v801_v22 = vmul.f32 %v2109_v18, %v2430_v31 }
 0x9ab   :  { %v739_v17 = vpop.permute.xlu0 %738 }
 0x9ac   :  { %v804_v19 = vpop.permute.xlu1 %803  ;;  %v741_v13 = vmul.f32 %v2107_v15, %v739_v17 }
 0x9ad   :  { %v806_v20 = vmul.f32 %v2109_v18, %v804_v19 }
 0x9ae   :  { %743 = vrot.lane.b32.xlu0 %v741_v13, %s2197_s10 }
 0x9af   :  { %808 = vrot.lane.b32.xlu1 %v806_v20, %s2194_s16 }
 0xa20   :  { %v744_v23 = vpop.permute.xlu0 %743 }
 0xa21   :  { %v809_v24 = vpop.permute.xlu1 %808  ;;  %v2469_v25 = vadd.f32 %v744_v23, %v736_v21 }
 0xa22   :  { %v2471_v26 = vadd.f32 %v809_v24, %v801_v22 }
 0xa23   :  { %2110 = vtanh.f32 %v2469_v25 }
 0xa24   :  { %2112 = vtanh.f32 %v2471_v26 }
 0xa2d   :  { %v2111_v27 = vpop.eup %2110 }
 0xa2e   :  { %v2113_v29 = vpop.eup %2112  ;;  %749 = vrot.lane.b32.xlu0 %v2111_v27, %s2197_s10 }
 0xa2f   :  { %814 = vrot.lane.b32.xlu1 %v2113_v29, %s2194_s16 }
 0xaa0   :  { %v750_v30 = vpop.permute.xlu0 %749 }
 0xaa1   :  { %v815_v28 = vpop.permute.xlu1 %814  ;;  %v2477_v32 = vmul.f32 %v2107_v15, %v750_v30 }
 0xaa2   :  { %v817_v31 = vmul.f32 %v2109_v18, %v815_v28 }
 0xaa3   :  { %v819_v33 = vpack.c.bf16 %v2477_v32, %v2477_v32 }
 0xaa4   :  { %v818_v36 = vpack.c.bf16 %v817_v31, %v817_v31 }
 0xaa5   :  { %821 = vrot.lane.b32.xlu0 %v819_v33, %s2198_s11 }
 0xaa6   :  { %867 = vrot.lane.b32.xlu1 %v818_v36, %s2195_s0 }
 0xb17   :  { %v822_v38 = vpop.permute.xlu0 %821 }
 0xb18   :  { %v868_v34 = vpop.permute.xlu1 %867  ;;  %1944 = vmatmul.mubr.msk.bf16.vlgmr.msra.gmra.mrb[24].mxu0 %vm34_vm4, %v822_v38 }
 0xb19   :  { %1952 = vmatmul.mubr.msk.bf16.vlgmr.msra.gmra.mrb[24].mxu1 %vm31_vm3, %v868_v34  ;;  %1956 = vmatpush3.bf16.msra.mxu0 %v2250_v3 }
 0xb1a   :  { %1957 = vmatprep.subr.bf16.mxu0 %v2192_v1  ;;  %1959 = vmatprep.mubr.msk.bf16.mxu0 %vm2193_vm1, %v2192_v1 }
 0xb1b   :  { %1964 = vmatpush3.bf16.msra.mxu1 %v2322_v41  ;;  %1965 = vmatprep.mubr.msk.bf16.mxu1 %vm2193_vm1, %v2192_v1 }
 0xb1c   :  { %1977 = vmatprep.subr.bf16.mxu1 %v2192_v1 }
 0xb1d   :  { %1958 = vmatpush3.bf16.msra.mxu0 %v2272_v10 }
 0xb1e   :  { %1969 = vmatprep.subr.bf16.mxu0 %v2192_v1 }
 0xb20   :  { %1960 = vmatmul.mubr.msk.bf16.vlgmr.msra.gmra.mrb[28].mxu0 %vm31_vm3, %v868_v34 }
 0xb21   :  { %1970 = vmatpush3.bf16.msra.mxu0 %v2313_v39  ;;  %1973 = vmatprep.mubr.msk.bf16.mxu0 %vm2193_vm1, %v2192_v1 }
 0xb22   :  { %1971 = vmatprep.subr.bf16.mxu0 %v2192_v1 }
 0xb25   :  { %1972 = vmatpush3.bf16.msra.mxu0 %v2334_v44 }
 0xb26   :  { %1985 = vmatprep.subr.bf16.mxu0 %v2192_v1 }
 0xbeb   :  { %v860_v40 = vpop.f32.mrb[24].mxu0 }
 0xbec   :  { %v906_v42 = vpop.f32.mrb[24].mxu1  ;;  %v1945_v43 = vpop.f32.mrb[25].mxu0 }
 0xbed   :  { %v907_v35 = vadd.f32 %v906_v42, %v860_v40  ;;  %v1953_v45 = vpop.f32.mrb[25].mxu1  ;;  %v863_v47 = vpop.f32.mrb[26].mxu0 }
 0xbee   :  { %v909_v48 = vpop.f32.mrb[26].mxu1  ;;  %v1946_v49 = vpop.f32.mrb[27].mxu0 }
 0xbef   :  { %v912_v50 = vadd.f32 %v2376_v61, %v907_v35  ;;  %v1954_v55 = vpop.f32.mrb[27].mxu1  ;;  %v128_v35 = vadd.f32 %v2288_v14, %v2357_v54 }
 0xbf1   :  { %2114 = vtanh.f32 %v912_v50  ;;  %v1767_v2 = vmul.f32 -1.442695, %v912_v50 }
 0xbf3   :  { %v971_v57 = vpop.f32.mrb[28].mxu0 }
 0xbf4   :  { %v977_v58 = vadd.f32 %v971_v57, %v125_v56  ;;  %v1961_v59 = vpop.f32.mrb[29].mxu0 }
 0xbf5   :  { %v974_v60 = vpop.f32.mrb[30].mxu0 }
 0xbf6   :  { %2116 = vtanh.f32 %v977_v58  ;;  %v1962_v62 = vpop.f32.mrb[31].mxu0  ;;  %v1769_v4 = vmul.f32 -1.442695, %v977_v58 }
 0xbf7   :  { %2118 = vpow2.f32 %v1767_v2 }
 0xbf8   :  { %2120 = vpow2.f32 %v1769_v4 }
 0xbfb   :  { %v2115_v63 = vpop.eup %2114 }
 0xbfc   :  { %922 = vrot.lane.b32.xlu0 %v2115_v63, %s2196_s9 }
 0xc00   :  { %v2117_v0 = vpop.eup %2116 }
 0xc01   :  { %987 = vrot.lane.b32.xlu1 %v2117_v0, %s2194_s16  ;;  %v2119_v5 = vpop.eup %2118 }
 0xc02   :  { %v916_v6 = vadd.f32 1.0, %v2119_v5  ;;  %v2121_v16 = vpop.eup %2120 }
 0xc03   :  { %v981_v52 = vadd.f32 1.0, %v2121_v16 }
 0xc04   :  { %2122 = vrcp.f32 %v916_v6 }
 0xc05   :  { %2124 = vrcp.f32 %v981_v52 }
 0xc0e   :  { %v2123_v7 = vpop.eup %2122 }
 0xc0f   :  { %v2125_v11 = vpop.eup %2124  ;;  %v920_v17 = vmul.f32 %v2123_v7, %v2469_v25 }
 0xc10   :  { %v985_v13 = vmul.f32 %v2125_v11, %v2471_v26 }
 0xc6e   :  { %v923_v8 = vpop.permute.xlu0 %922 }
 0xc6f   :  { %v925_v9 = vmul.f32 %v2123_v7, %v923_v8 }
 0xc71   :  { %927 = vrot.lane.b32.xlu0 %v925_v9, %s2197_s10 }
 0xc73   :  { %v988_v12 = vpop.permute.xlu1 %987 }
 0xc74   :  { %v990_v15 = vmul.f32 %v2125_v11, %v988_v12 }
 0xc76   :  { %992 = vrot.lane.b32.xlu1 %v990_v15, %s2194_s16 }
 0xce3   :  { %v928_v18 = vpop.permute.xlu0 %927 }
 0xce4   :  { %v2510_v19 = vadd.f32 %v928_v18, %v920_v17 }
 0xce6   :  { %2126 = vtanh.f32 %v2510_v19 }
 0xce8   :  { %v993_v20 = vpop.permute.xlu1 %992 }
 0xce9   :  { %v2514_v21 = vadd.f32 %v993_v20, %v985_v13 }
 0xceb   :  { %2128 = vtanh.f32 %v2514_v21 }
 0xcf0   :  { %v2127_v22 = vpop.eup %2126 }
 0xcf1   :  { %933 = vrot.lane.b32.xlu0 %v2127_v22, %s2197_s10 }
 0xcf5   :  { %v2129_v23 = vpop.eup %2128 }
 0xcf6   :  { %998 = vrot.lane.b32.xlu1 %v2129_v23, %s2194_s16 }
 0xd63   :  { %v934_v24 = vpop.permute.xlu0 %933 }
 0xd64   :  { %v2519_v25 = vmul.f32 %v2123_v7, %v934_v24 }
 0xd66   :  { %v1003_v27 = vpack.c.bf16 %v2519_v25, %v2519_v25 }
 0xd68   :  { %1005 = vrot.lane.b32.xlu0 %v1003_v27, %s2198_s11  ;;  %v999_v26 = vpop.permute.xlu1 %998 }
 0xd69   :  { %v1001_v29 = vmul.f32 %v2125_v11, %v999_v26 }
 0xd6b   :  { %v1002_v30 = vpack.c.bf16 %v1001_v29, %v1001_v29 }
 0xd6d   :  { %1051 = vrot.lane.b32.xlu1 %v1002_v30, %s2195_s0 }
 0xdda   :  { %v1006_v28 = vpop.permute.xlu0 %1005 }
 0xddb   :  { %1966 = vmatmul.mubr.msk.bf16.vlgmr.msra.gmra.mrb[28].mxu1 %vm34_vm4, %v1006_v28 }
 0xddc   :  { %1978 = vmatpush3.bf16.msra.mxu1 %v2250_v3  ;;  %1981 = vmatprep.mubr.msk.bf16.mxu1 %vm2193_vm1, %v2192_v1 }
 0xddd   :  { %1979 = vmatprep.subr.bf16.mxu1 %v2192_v1 }
 0xddf   :  { %v1052_v31 = vpop.permute.xlu1 %1051 }
 0xde0   :  { %1980 = vmatpush3.bf16.msra.mxu1 %v2272_v10  ;;  %1974 = vmatmul.mubr.msk.bf16.vlgmr.msra.gmra.mrb[32].mxu0 %vm31_vm3, %v1052_v31 }
 0xde1   :  { %1991 = vmatprep.subr.bf16.mxu1 %v2192_v1  ;;  %1986 = vmatpush3.bf16.msra.mxu0 %v2322_v41 }
 0xde2   :  { %1987 = vmatprep.mubr.msk.bf16.mxu0 %vm2193_vm1, %v2192_v1  ;;  %1999 = vmatprep.subr.bf16.mxu0 %v2192_v1 }
 0xde3   :  { %1982 = vmatmul.mubr.msk.bf16.vlgmr.msra.gmra.mrb[32].mxu1 %vm31_vm3, %v1052_v31 }
 0xde4   :  { %1992 = vmatpush3.bf16.msra.mxu1 %v2313_v39  ;;  %1995 = vmatprep.mubr.msk.bf16.mxu1 %vm2193_vm1, %v2192_v1 }
 0xde5   :  { %1993 = vmatprep.subr.bf16.mxu1 %v2192_v1 }
 0xde8   :  { %1994 = vmatpush3.bf16.msra.mxu1 %v2334_v44 }
 0xde9   :  { %2007 = vmatprep.subr.bf16.mxu1 %v2192_v1 }
 0xeae   :  { %v1044_v33 = vpop.f32.mrb[28].mxu1 }
 0xeaf   :  { %v1967_v36 = vpop.f32.mrb[29].mxu1 }
 0xeb0   :  { %v1047_v38 = vpop.f32.mrb[30].mxu1 }
 0xeb1   :  { %v1968_v34 = vpop.f32.mrb[31].mxu1  ;;  %v133_v38 = vadd.f32 %v2351_v51, %v2288_v14 }
 0xeb3   :  { %v1090_v40 = vpop.f32.mrb[32].mxu0 }
 0xeb4   :  { %v1091_v42 = vadd.f32 %v1090_v40, %v1044_v33  ;;  %v1975_v43 = vpop.f32.mrb[33].mxu0 }
 0xeb5   :  { %v1093_v45 = vpop.f32.mrb[34].mxu0 }
 0xeb6   :  { %v1096_v47 = vadd.f32 %v2376_v61, %v1091_v42  ;;  %v1155_v48 = vpop.f32.mrb[32].mxu1  ;;  %v1976_v49 = vpop.f32.mrb[35].mxu0 }
 0xeb7   :  { %v1161_v50 = vadd.f32 %v1155_v48, %v128_v35  ;;  %v1983_v55 = vpop.f32.mrb[33].mxu1 }
 0xeb8   :  { %2130 = vtanh.f32 %v1096_v47  ;;  %v1158_v56 = vpop.f32.mrb[34].mxu1  ;;  %v1772_v60 = vmul.f32 -1.442695, %v1096_v47 }
 0xeb9   :  { %2132 = vtanh.f32 %v1161_v50  ;;  %v1984_v57 = vpop.f32.mrb[35].mxu1  ;;  %v1774_v62 = vmul.f32 -1.442695, %v1161_v50 }
 0xeba   :  { %2134 = vpow2.f32 %v1772_v60 }
 0xebb   :  { %2136 = vpow2.f32 %v1774_v62 }
 0xec2   :  { %v2131_v58 = vpop.eup %2130 }
 0xec3   :  { %v2133_v59 = vpop.eup %2132  ;;  %1106 = vrot.lane.b32.xlu0 %v2131_v58, %s2196_s9 }
 0xec4   :  { %1171 = vrot.lane.b32.xlu1 %v2133_v59, %s2194_s16  ;;  %v2135_v54 = vpop.eup %2134 }
 0xec5   :  { %v2137_v63 = vpop.eup %2136  ;;  %v1100_v0 = vadd.f32 1.0, %v2135_v54 }
 0xec6   :  { %v1165_v2 = vadd.f32 1.0, %v2137_v63 }
 0xec7   :  { %2138 = vrcp.f32 %v1100_v0 }
 0xec8   :  { %2140 = vrcp.f32 %v1165_v2 }
 0xed1   :  { %v2139_v4 = vpop.eup %2138 }
 0xed2   :  { %v2141_v6 = vpop.eup %2140  ;;  %v1104_v8 = vmul.f32 %v2139_v4, %v2510_v19 }
 0xed3   :  { %v1169_v9 = vmul.f32 %v2141_v6, %v2514_v21 }
 0xf35   :  { %v1107_v5 = vpop.permute.xlu0 %1106 }
 0xf36   :  { %v1172_v16 = vpop.permute.xlu1 %1171  ;;  %v1109_v52 = vmul.f32 %v2139_v4, %v1107_v5 }
 0xf37   :  { %v1174_v7 = vmul.f32 %v2141_v6, %v1172_v16 }
 0xf38   :  { %1111 = vrot.lane.b32.xlu0 %v1109_v52, %s2197_s10 }
 0xf39   :  { %1176 = vrot.lane.b32.xlu1 %v1174_v7, %s2194_s16 }
 0xfaa   :  { %v1112_v11 = vpop.permute.xlu0 %1111 }
 0xfab   :  { %v1177_v12 = vpop.permute.xlu1 %1176  ;;  %v2553_v15 = vadd.f32 %v1112_v11, %v1104_v8 }
 0xfac   :  { %v2555_v17 = vadd.f32 %v1177_v12, %v1169_v9 }
 0xfad   :  { %2142 = vtanh.f32 %v2553_v15 }
 0xfae   :  { %2144 = vtanh.f32 %v2555_v17 }
 0xfb7   :  { %v2143_v18 = vpop.eup %2142 }
 0xfb8   :  { %v2145_v13 = vpop.eup %2144  ;;  %1117 = vrot.lane.b32.xlu0 %v2143_v18, %s2197_s10 }
 0xfb9   :  { %1182 = vrot.lane.b32.xlu1 %v2145_v13, %s2194_s16  ;;  %v2187_v13 = vld [vmem:[%s2681_s3 + $0x8] sm:$0xff]  }
0x102a   :  { %v1118_v20 = vpop.permute.xlu0 %1117 }
0x102b   :  { %v1183_v19 = vpop.permute.xlu1 %1182  ;;  %v2561_v22 = vmul.f32 %v2139_v4, %v1118_v20  ;;  %v2188_v20 = vld [vmem:[%s2685_s5] sm:$0xff]  }
0x102c   :  { %v1185_v21 = vmul.f32 %v2141_v6, %v1183_v19  ;;  %v2189_v19 = vld [vmem:[%s2684_s4] sm:$0xff]  }
0x102d   :  { %v1187_v23 = vpack.c.bf16 %v2561_v22, %v2561_v22 }
0x102e   :  { %v1186_v24 = vpack.c.bf16 %v1185_v21, %v1185_v21 }
0x102f   :  { %1189 = vrot.lane.b32.xlu0 %v1187_v23, %s2198_s11 }
0x1030   :  { %1235 = vrot.lane.b32.xlu1 %v1186_v24, %s2195_s0 }
0x10a1   :  { %v1190_v27 = vpop.permute.xlu0 %1189 }
0x10a2   :  { %v1236_v26 = vpop.permute.xlu1 %1235  ;;  %1988 = vmatmul.mubr.msk.bf16.vlgmr.msra.gmra.mrb[36].mxu0 %vm34_vm4, %v1190_v27 }
0x10a3   :  { %1996 = vmatmul.mubr.msk.bf16.vlgmr.msra.gmra.mrb[36].mxu1 %vm31_vm3, %v1236_v26  ;;  %2000 = vmatpush3.bf16.msra.mxu0 %v2250_v3 }
0x10a4   :  { %2001 = vmatprep.subr.bf16.mxu0 %v2192_v1  ;;  %2003 = vmatprep.mubr.msk.bf16.mxu0 %vm2193_vm1, %v2192_v1 }
0x10a5   :  { %2008 = vmatpush3.bf16.msra.mxu1 %v2322_v41  ;;  %2009 = vmatprep.mubr.msk.bf16.mxu1 %vm2193_vm1, %v2192_v1 }
0x10a6   :  { %2021 = vmatprep.subr.bf16.mxu1 %v2192_v1 }
0x10a7   :  { %2002 = vmatpush3.bf16.msra.mxu0 %v2272_v10 }
0x10a8   :  { %2013 = vmatprep.subr.bf16.mxu0 %v2192_v1 }
0x10aa   :  { %2004 = vmatmul.mubr.msk.bf16.vlgmr.msra.gmra.mrb[40].mxu0 %vm31_vm3, %v1236_v26 }
0x10ab   :  { %2014 = vmatpush3.bf16.msra.mxu0 %v2313_v39  ;;  %2017 = vmatprep.mubr.msk.bf16.mxu0 %vm2193_vm1, %v2192_v1 }
0x10ac   :  { %2015 = vmatprep.subr.bf16.mxu0 %v2192_v1 }
0x10af   :  { %2016 = vmatpush3.bf16.msra.mxu0 %v2334_v44 }
0x10b0   :  { %2029 = vmatprep.subr.bf16.mxu0 %v2192_v1 }
0x1175   :  { %v1228_v3 = vpop.f32.mrb[36].mxu0 }
0x1176   :  { %v1274_v41 = vpop.f32.mrb[36].mxu1  ;;  %v1989_v29 = vpop.f32.mrb[37].mxu0 }
0x1177   :  { %v1275_v30 = vadd.f32 %v1274_v41, %v1228_v3  ;;  %v1997_v10 = vpop.f32.mrb[37].mxu1  ;;  %v1231_v28 = vpop.f32.mrb[38].mxu0  ;;  %v2190_v29 = vld [vmem:[%s2683_s2] ss:$0 sm:$0xff] }
0x1178   :  { %v1277_v31 = vpop.f32.mrb[38].mxu1  ;;  %v1990_v33 = vpop.f32.mrb[39].mxu0 }
0x1179   :  { %v1280_v36 = vadd.f32 %v2376_v61, %v1275_v30  ;;  %v1998_v39 = vpop.f32.mrb[39].mxu1  ;;  %v136_v30 = vadd.f32 %v2190_v29, %v2355_v53 }
0x117b   :  { %2146 = vtanh.f32 %v1280_v36  ;;  %v1777_v48 = vmul.f32 -1.442695, %v1280_v36 }
0x117d   :  { %v1339_v34 = vpop.f32.mrb[40].mxu0 }
0x117e   :  { %v1345_v40 = vadd.f32 %v1339_v34, %v133_v38  ;;  %v2005_v42 = vpop.f32.mrb[41].mxu0 }
0x117f   :  { %v1342_v43 = vpop.f32.mrb[42].mxu0 }
0x1180   :  { %2148 = vtanh.f32 %v1345_v40  ;;  %v2006_v35 = vpop.f32.mrb[43].mxu0  ;;  %v1779_v49 = vmul.f32 -1.442695, %v1345_v40 }
0x1181   :  { %2150 = vpow2.f32 %v1777_v48 }
0x1182   :  { %2152 = vpow2.f32 %v1779_v49 }
0x1185   :  { %v2147_v45 = vpop.eup %2146 }
0x1186   :  { %1290 = vrot.lane.b32.xlu0 %v2147_v45, %s2196_s9 }
0x118a   :  { %v2149_v47 = vpop.eup %2148 }
0x118b   :  { %1355 = vrot.lane.b32.xlu1 %v2149_v47, %s2194_s16  ;;  %v2151_v50 = vpop.eup %2150 }
0x118c   :  { %v1284_v55 = vadd.f32 1.0, %v2151_v50  ;;  %v2153_v56 = vpop.eup %2152 }
0x118d   :  { %v1349_v14 = vadd.f32 1.0, %v2153_v56 }
0x118e   :  { %2154 = vrcp.f32 %v1284_v55 }
0x118f   :  { %2156 = vrcp.f32 %v1349_v14 }
0x1198   :  { %v2155_v51 = vpop.eup %2154 }
0x1199   :  { %v2157_v59 = vpop.eup %2156  ;;  %v1288_v54 = vmul.f32 %v2155_v51, %v2553_v15 }
0x119a   :  { %v1353_v2 = vmul.f32 %v2157_v59, %v2555_v17  ;;  %v2186_v17 = vld [vmem:[%s2681_s3] sm:$0xff]  }
0x11f8   :  { %v1291_v57 = vpop.permute.xlu0 %1290 }
0x11f9   :  { %v1293_v58 = vmul.f32 %v2155_v51, %v1291_v57 }
0x11fb   :  { %1295 = vrot.lane.b32.xlu0 %v1293_v58, %s2197_s10 }
0x11fd   :  { %v1356_v60 = vpop.permute.xlu1 %1355 }
0x11fe   :  { %v1358_v62 = vmul.f32 %v2157_v59, %v1356_v60 }
0x1200   :  { %1360 = vrot.lane.b32.xlu1 %v1358_v62, %s2194_s16 }
0x126d   :  { %v1296_v63 = vpop.permute.xlu0 %1295 }
0x126e   :  { %v2594_v0 = vadd.f32 %v1296_v63, %v1288_v54 }
0x1270   :  { %2158 = vtanh.f32 %v2594_v0 }
0x1272   :  { %v1361_v4 = vpop.permute.xlu1 %1360 }
0x1273   :  { %v2598_v5 = vadd.f32 %v1361_v4, %v1353_v2 }
0x1275   :  { %2160 = vtanh.f32 %v2598_v5 }
0x127a   :  { %v2159_v6 = vpop.eup %2158 }
0x127b   :  { %1301 = vrot.lane.b32.xlu0 %v2159_v6, %s2197_s10 }
0x127f   :  { %v2161_v16 = vpop.eup %2160 }
0x1280   :  { %1366 = vrot.lane.b32.xlu1 %v2161_v16, %s2194_s16 }
0x12ed   :  { %v1302_v52 = vpop.permute.xlu0 %1301 }
0x12ee   :  { %v2603_v7 = vmul.f32 %v2155_v51, %v1302_v52 }
0x12f0   :  { %v1371_v8 = vpack.c.bf16 %v2603_v7, %v2603_v7 }
0x12f2   :  { %1373 = vrot.lane.b32.xlu0 %v1371_v8, %s2198_s11  ;;  %v1367_v9 = vpop.permute.xlu1 %1366 }
0x12f3   :  { %v1369_v11 = vmul.f32 %v2157_v59, %v1367_v9 }
0x12f5   :  { %v1370_v12 = vpack.c.bf16 %v1369_v11, %v1369_v11 }
0x12f7   :  { %1419 = vrot.lane.b32.xlu1 %v1370_v12, %s2195_s0 }
0x1364   :  { %v1374_v15 = vpop.permute.xlu0 %1373 }
0x1365   :  { %2010 = vmatmul.mubr.msk.bf16.vlgmr.msra.gmra.mrb[40].mxu1 %vm34_vm4, %v1374_v15 }
0x1366   :  { %2022 = vmatpush3.bf16.msra.mxu1 %v2186_v17  ;;  %2025 = vmatprep.mubr.msk.bf16.mxu1 %vm2193_vm1, %v2192_v1 }
0x1367   :  { %2023 = vmatprep.subr.bf16.mxu1 %v2192_v1 }
0x1369   :  { %v1420_v18 = vpop.permute.xlu1 %1419 }
0x136a   :  { %2024 = vmatpush3.bf16.msra.mxu1 %v2187_v13  ;;  %2018 = vmatmul.mubr.msk.bf16.vlgmr.msra.gmra.mrb[44].mxu0 %vm31_vm3, %v1420_v18  ;;  %v2191_v13 = vld [vmem:[%s2686_s6] ss:$0 sm:$0xff]  ;;  %s2199_s6 = smov 48  }
0x136b   :  { %2035 = vmatprep.subr.bf16.mxu1 %v2192_v1  ;;  %2030 = vmatpush3.bf16.msra.mxu0 %v2188_v20 }
0x136c   :  { %2031 = vmatprep.mubr.msk.bf16.mxu0 %vm2193_vm1, %v2192_v1 }
0x136d   :  { %2026 = vmatmul.mubr.msk.bf16.vlgmr.msra.gmra.mrb[44].mxu1 %vm31_vm3, %v1420_v18 }
0x136e   :  { %2036 = vmatpush3.bf16.msra.mxu1 %v2189_v19  ;;  %2039 = vmatprep.mubr.msk.bf16.mxu1 %vm2193_vm1, %v2192_v1 }
0x136f   :  { %2037 = vmatprep.subr.bf16.mxu1 %v2192_v1 }
0x1372   :  { %2038 = vmatpush3.bf16.msra.mxu1 %v2334_v44 }
0x1438   :  { %v1412_v21 = vpop.f32.mrb[40].mxu1 }
0x1439   :  { %v2011_v23 = vpop.f32.mrb[41].mxu1 }
0x143a   :  { %v1415_v24 = vpop.f32.mrb[42].mxu1 }
0x143b   :  { %v2012_v27 = vpop.f32.mrb[43].mxu1 }
0x143d   :  { %v1458_v26 = vpop.f32.mrb[44].mxu0 }
0x143e   :  { %v1459_v3 = vadd.f32 %v1458_v26, %v1412_v21  ;;  %v2019_v41 = vpop.f32.mrb[45].mxu0 }
0x143f   :  { %v1461_v10 = vpop.f32.mrb[46].mxu0 }
0x1440   :  { %v1464_v28 = vadd.f32 %v2376_v61, %v1459_v3  ;;  %v1523_v31 = vpop.f32.mrb[44].mxu1  ;;  %v2020_v1 = vpop.f32.mrb[47].mxu0 }
0x1441   :  { %v1529_v33 = vadd.f32 %v1523_v31, %v136_v30  ;;  %v2027_v44 = vpop.f32.mrb[45].mxu1 }
0x1442   :  { %2162 = vtanh.f32 %v1464_v28  ;;  %v1526_v36 = vpop.f32.mrb[46].mxu1  ;;  %v1782_v40 = vmul.f32 -1.442695, %v1464_v28 }
0x1443   :  { %2164 = vtanh.f32 %v1529_v33  ;;  %v2028_v39 = vpop.f32.mrb[47].mxu1  ;;  %v1784_v42 = vmul.f32 -1.442695, %v1529_v33 }
0x1444   :  { %2166 = vpow2.f32 %v1782_v40 }
0x1445   :  { %2168 = vpow2.f32 %v1784_v42 }
0x144c   :  { %v2163_v38 = vpop.eup %2162 }
0x144d   :  { %v2165_v34 = vpop.eup %2164  ;;  %1474 = vrot.lane.b32.xlu0 %v2163_v38, %s2196_s9 }
0x144e   :  { %1539 = vrot.lane.b32.xlu1 %v2165_v34, %s2194_s16  ;;  %v2167_v53 = vpop.eup %2166 }
0x144f   :  { %v2169_v61 = vpop.eup %2168  ;;  %v1468_v43 = vadd.f32 1.0, %v2167_v53 }
0x1450   :  { %v1533_v35 = vadd.f32 1.0, %v2169_v61 }
0x1451   :  { %2170 = vrcp.f32 %v1468_v43 }
0x1452   :  { %2172 = vrcp.f32 %v1533_v35 }
0x145b   :  { %v2171_v45 = vpop.eup %2170 }
0x145c   :  { %v2173_v48 = vpop.eup %2172  ;;  %v1472_v56 = vmul.f32 %v2171_v45, %v2594_v0 }
0x145d   :  { %v1537_v14 = vmul.f32 %v2173_v48, %v2598_v5 }
0x14bf   :  { %v1475_v47 = vpop.permute.xlu0 %1474 }
0x14c0   :  { %v1540_v49 = vpop.permute.xlu1 %1539  ;;  %v1477_v50 = vmul.f32 %v2171_v45, %v1475_v47 }
0x14c1   :  { %v1542_v55 = vmul.f32 %v2173_v48, %v1540_v49 }
0x14c2   :  { %1479 = vrot.lane.b32.xlu0 %v1477_v50, %s2197_s10 }
0x14c3   :  { %1544 = vrot.lane.b32.xlu1 %v1542_v55, %s2194_s16 }
0x1534   :  { %v1480_v51 = vpop.permute.xlu0 %1479 }
0x1535   :  { %v1545_v57 = vpop.permute.xlu1 %1544  ;;  %v1482_v58 = vadd.f32 %v1480_v51, %v1472_v56 }
0x1536   :  { %v1547_v59 = vadd.f32 %v1545_v57, %v1537_v14 }
0x1537   :  { %2174 = vtanh.f32 %v1482_v58 }
0x1538   :  { %2176 = vtanh.f32 %v1547_v59 }
0x1541   :  { %v2175_v60 = vpop.eup %2174 }
0x1542   :  { %v2177_v62 = vpop.eup %2176  ;;  %1485 = vrot.lane.b32.xlu0 %v2175_v60, %s2197_s10 }
0x1543   :  { %1550 = vrot.lane.b32.xlu1 %v2177_v62, %s2194_s16 }
0x15b4   :  { %v1486_v54 = vpop.permute.xlu0 %1485 }
0x15b5   :  { %v1551_v63 = vpop.permute.xlu1 %1550  ;;  %v1488_v2 = vmul.f32 %v2171_v45, %v1486_v54 }
0x15b6   :  { %v1553_v4 = vmul.f32 %v2173_v48, %v1551_v63 }
0x15b7   :  { %v1555_v6 = vpack.c.bf16 %v1488_v2, %v1488_v2 }
0x15b8   :  { %v1554_v0 = vpack.c.bf16 %v1553_v4, %v1553_v4 }
0x15b9   :  { %1557 = vrot.lane.b32.xlu0 %v1555_v6, %s2198_s11 }
0x15ba   :  { %1603 = vrot.lane.b32.xlu1 %v1554_v0, %s2195_s0 }
0x162b   :  { %v1558_v5 = vpop.permute.xlu0 %1557 }
0x162c   :  { %v1604_v16 = vpop.permute.xlu1 %1603  ;;  %2032 = vmatmul.mubr.msk.bf16.vlgmr.msra.gmra.mrb[48].mxu0 %vm34_vm4, %v1558_v5 }
0x162d   :  { %2040 = vmatmul.mubr.msk.bf16.vlgmr.msra.gmra.mrb[48].mxu1 %vm31_vm3, %v1604_v16 }
0x16ff   :  { %v1596_v52 = vpop.f32.mrb[48].mxu0 }
0x1700   :  { %v1642_v8 = vpop.f32.mrb[48].mxu1  ;;  %v2033_v9 = vpop.f32.mrb[49].mxu0 }
0x1701   :  { %v1643_v11 = vadd.f32 %v1642_v8, %v1596_v52  ;;  %v2041_v12 = vpop.f32.mrb[49].mxu1  ;;  %v1599_v15 = vpop.f32.mrb[50].mxu0 }
0x1702   :  { %v1645_v17 = vpop.f32.mrb[50].mxu1  ;;  %v2034_v18 = vpop.f32.mrb[51].mxu0 }
0x1703   :  { %v1648_v20 = vadd.f32 %v2191_v13, %v1643_v11  ;;  %v2042_v19 = vpop.f32.mrb[51].mxu1 }
0x1705   :  { %2178 = vtanh.f32 %v1648_v20  ;;  %v1787_v23 = vmul.f32 -1.442695, %v1648_v20 }
0x1707   :  { %2180 = vpow2.f32 %v1787_v23 }
0x170f   :  { %v2179_v21 = vpop.eup %2178 }
0x1710   :  { %1658 = vrot.lane.b32.xlu0 %v2179_v21, %s2196_s9 }
0x1711   :  { %v2181_v24 = vpop.eup %2180 }
0x1712   :  { %v1652_v27 = vadd.f32 1.0, %v2181_v24 }
0x1714   :  { %2182 = vrcp.f32 %v1652_v27 }
0x171e   :  { %v2183_v26 = vpop.eup %2182 }
0x171f   :  { %v1656_v29 = vmul.f32 %v2183_v26, %v1482_v58 }
0x1782   :  { %v1659_v3 = vpop.permute.xlu0 %1658 }
0x1783   :  { %v1661_v41 = vmul.f32 %v2183_v26, %v1659_v3 }
0x1785   :  { %1663 = vrot.lane.b32.xlu1 %v1661_v41, %s2197_s10 }
0x1789   :  { %1694 = vrot.lane.b32.xlu1 %v2393_v46, %s2198_s11 }
0x178d   :  { %1702 = vrot.lane.b32.xlu1 %v2519_v25, %s2197_s10 }
0x1791   :  { %1710 = vrot.lane.b32.xlu1 %v2603_v7, %s2199_s6 }
0x1795   :  { %1679 = vrot.lane.b32.xlu1 %v1547_v59, %s2198_s11 }
0x17f7   :  { %v1664_v30 = vpop.permute.xlu1 %1663 }
0x17f8   :  { %v1666_v10 = vadd.f32 %v1664_v30, %v1656_v29 }
0x17fa   :  { %2184 = vtanh.f32 %v1666_v10 }
0x17fb   :  { %v1695_v28 = vpop.permute.xlu1 %1694 }
0x17ff   :  { %v1703_v31 = vpop.permute.xlu1 %1702 }
0x1803   :  { %v1711_v1 = vpop.permute.xlu1 %1710 }
0x1804   :  { %v2185_v33 = vpop.eup %2184 }
0x1805   :  { %1669 = vrot.lane.b32.xlu0 %v2185_v33, %s2197_s10 }
0x1807   :  { %v1680_v44 = vpop.permute.xlu1 %1679 }
0x1808   :  { %1682 = vst.msk [vmem:[#allocation3] sm:$0xff] %vm31_vm3, %v1680_v44 }
0x1809   :  { %1698 = vrot.lane.b32.xlu0 %v2435_v37, %s2200_s21 }
0x180d   :  { %1706 = vrot.lane.b32.xlu0 %v2561_v22, %s2194_s16 }
0x1811   :  { %1714 = vrot.lane.b32.xlu0 %v1488_v2, %s2195_s0 }
0x1815   :  { %1674 = vrot.lane.b32.xlu0 %v1553_v4, %s2195_s0 }
0x1877   :  { %v1670_v46 = vpop.permute.xlu0 %1669 }
0x1878   :  { %v1672_v25 = vmul.f32 %v2183_v26, %v1670_v46 }
0x187a   :  { %1684 = vrot.lane.b32.xlu0 %v1672_v25, %s2198_s11  ;;  %1717 = vrot.lane.b32.xlu1 %v1672_v25, %s2196_s9 }
0x187b   :  { %v1699_v7 = vpop.permute.xlu0 %1698 }
0x187c   :  { %v1720_v36 = vsel %vm34_vm4, %v1695_v28, %v1699_v7 }
0x187d   :  { %v1721_v37 = vsel %vm31_vm3, %v1720_v36, %v2477_v32 }
0x187e   :  { %1689 = vrot.lane.b32.xlu1 %v1666_v10, %s2200_s21  ;;  %v1723_v22 = vsel %vm1722_vm5, %v1721_v37, %v1703_v31 }
0x187f   :  { %v1707_v39 = vpop.permute.xlu0 %1706 }
0x1880   :  { %v1725_v38 = vsel %vm1724_vm6, %v1723_v22, %v1707_v39 }
0x1881   :  { %v1727_v34 = vsel %vm1726_vm7, %v1725_v38, %v1711_v1 }
0x1883   :  { %v1715_v40 = vpop.permute.xlu0 %1714 }
0x1884   :  { %v1729_v42 = vsel %vm1728_vm8, %v1727_v34, %v1715_v40 }
0x1887   :  { %v1675_v53 = vpop.permute.xlu0 %1674 }
0x1888   :  { %1677 = vst.msk [vmem:[#allocation2] sm:$0xff] %vm31_vm3, %v1675_v53 }
0x18ec   :  { %v1718_v61 = vpop.permute.xlu1 %1717  ;;  %v1685_v43 = vpop.permute.xlu0 %1684 }
0x18ed   :  { %v1731_v35 = vsel %vm1730_vm9, %v1729_v42, %v1718_v61  ;;  %1687 = vst.msk [vmem:[#allocation4] sm:$0xff] %vm34_vm4, %v1685_v43 }
0x18ee   :  { %1732 = vst [vmem:[%s2687_s7] sm:$0xff] %v1731_v35 }
0x18f0   :  { %v1690_v32 = vpop.permute.xlu1 %1689 }
0x18f1   :  { %1692 = vst.msk [vmem:[#allocation5] sm:$0xff] %vm34_vm4, %v1690_v32 }

</bundles_post_ra>
